<compile_context>
chip_gen: v7x
topology: tpu7x:2x2x1
jax: 0.10.0
libtpu: 0.0.40
codegen_flags: <defaults>
</compile_context>

<pallas_src>
import numpy as np
import jax
import jax.numpy as jnp
from jax.experimental import pallas as pl
from jax.experimental.pallas import tpu as pltpu


# ---------------------------------------------------------------------------
# host-side glue (shape-only numpy, runs at trace time)
# ---------------------------------------------------------------------------
def conv_select_matrices(H, W, kh, kw, stride, pad):
    """One 0/1 matrix per kernel tap: S[k] @ flat(img) gathers the tap-shifted,
    strided spatial window; zero rows encode zero padding."""
    Ho = (H + 2 * pad - kh) // stride + 1
    Wo = (W + 2 * pad - kw) // stride + 1
    mats = np.zeros((kh * kw, Ho * Wo, H * W), np.float32)
    for di in range(kh):
        for dj in range(kw):
            k = di * kw + dj
            for i in range(Ho):
                for j in range(Wo):
                    ii = i * stride + di - pad
                    jj = j * stride + dj - pad
                    if 0 <= ii < H and 0 <= jj < W:
                        mats[k, i * Wo + j, ii * W + jj] = 1.0
    return mats, Ho, Wo


def bilinear_matrix(out_size, in_size):
    """1-D weights of PyTorch F.interpolate(mode='bilinear', align_corners=False)."""
    M = np.zeros((out_size, in_size), np.float32)
    scale = in_size / out_size
    for o in range(out_size):
        src = max((o + 0.5) * scale - 0.5, 0.0)
        i0 = min(int(np.floor(src)), in_size - 1)
        i1 = min(i0 + 1, in_size - 1)
        l1 = src - i0
        M[o, i0] += 1.0 - l1
        M[o, i1] += l1
    return M


def _ceil_to(v, m):
    return (v + m - 1) // m * m


# ---------------------------------------------------------------------------
# the Pallas kernel: one invocation processes the whole batch
# ---------------------------------------------------------------------------
def esa_kernel(x_ref, wtop_ref, btop_ref, w2_ref, b2_ref, w3_ref, b3_ref,
               w4_ref, b4_ref, s2_ref, pmask_ref, u3_ref, o_ref):
    f32 = jnp.float32
    bf16 = jnp.bfloat16

    x = x_ref[...]                                  # (B*C, HWp) f32
    BF = w2_ref.shape[0]                            # B * esa_channels
    NT = w2_ref.shape[1] // BF                      # 9 taps
    n2p = pmask_ref.shape[1]                        # lane-padded conv2 output size

    # conv1 (1x1) and conv_f (1x1 on conv1's output), fused into one
    # block-diagonal channel matmul; rows 0:BF = c1_, rows BF:2BF = cf.
    top = jnp.dot(wtop_ref[...], x.astype(bf16),
                  preferred_element_type=f32) + btop_ref[...]          # (2BF, HWp)
    c1_ = top[:BF, :]
    cf = top[BF:, :]

    # conv2 (3x3, stride 2, VALID): one gather matmul over all 9 taps
    # (lane-concatenated 0/1 selectors), a lane-aligned sublane restack,
    # then a single K = NT*BF channel matmul.
    g = jnp.dot(c1_.astype(bf16), s2_ref[...],
                preferred_element_type=f32)                            # (BF, NT*n2p)
    stacked = jnp.concatenate(
        [g[:, k * n2p:(k + 1) * n2p] for k in range(NT)], axis=0)      # (NT*BF, n2p)
    c1 = jnp.dot(w2_ref[...], stacked.astype(bf16),
                 preferred_element_type=f32) + b2_ref[...]             # (BF, n2p)

    # max_pool2d (7x7, stride 3, VALID): vectorized masked lane reductions.
    pm = pmask_ref[...]                                                # (n_p, n2p)
    masked = jnp.where(pm[None, :, :] > 0.5, c1[:, None, :], -jnp.inf) # (BF, n_p, n2p)
    vmax = jnp.max(masked, axis=-1)                                    # (BF, n_p)

    # conv3 (3x3, pad 1) fused with the bilinear upsample: all 9 per-tap
    # channel mixes as one vstacked matmul, tiny restack, then one matmul
    # against the vstacked (bilinear @ tap-gather) matrices.
    t = jnp.dot(w3_ref[...], vmax.astype(bf16),
                preferred_element_type=f32)                            # (NT*BF, n_p)
    t2 = jnp.concatenate(
        [t[k * BF:(k + 1) * BF, :] for k in range(NT)], axis=1)        # (BF, NT*n_p)
    c3u = jnp.dot(t2.astype(bf16), u3_ref[...],
                  preferred_element_type=f32) + b3_ref[...]            # (BF, HWp)

    # conv4 (1x1) + sigmoid gating.
    c4 = jnp.dot(w4_ref[...], (c3u + cf).astype(bf16),
                 preferred_element_type=f32) + b4_ref[...]             # (B*C, HWp)
    m = pl.reciprocal(1.0 + jnp.exp(-c4), approx=True)
    o_ref[...] = (x * m).astype(o_ref.dtype)


# ---------------------------------------------------------------------------
# wrapper: NCHW -> (B*C, HWp), constants, pallas_call
# ---------------------------------------------------------------------------
def esa_pallas(x_nchw, params):
    B, C, H, W = x_nchw.shape
    F = params["w1"].shape[1]
    HW = H * W
    HWp = _ceil_to(HW, 128)
    NT = 9

    # ---- spatial structure (numpy, trace time) ----
    s2_np, H2, W2 = conv_select_matrices(H, W, 3, 3, 2, 0)        # (9, n2, HW)
    n2 = H2 * W2
    n2p = _ceil_to(n2, 128)
    s2cat = np.zeros((HWp, NT * n2p), np.float32)                 # lane-concat gather
    for k in range(NT):
        s2cat[:HW, k * n2p:k * n2p + n2] = s2_np[k].T

    sp_np, Hp, Wp = conv_select_matrices(H2, W2, 7, 7, 3, 0)      # (49, n_p, n2)
    n_p = Hp * Wp
    pmask = np.zeros((n_p, n2p), np.float32)                      # pool-window masks
    pmask[:, :n2] = sp_np.max(axis=0)

    s3_np, Hp3, Wp3 = conv_select_matrices(Hp, Wp, 3, 3, 1, 1)    # (9, n_p, n_p)
    assert (Hp3, Wp3) == (Hp, Wp)
    bmat = np.kron(bilinear_matrix(H, Hp), bilinear_matrix(W, Wp))    # (HW, n_p)
    u3cat = np.zeros((NT * n_p, HWp), np.float32)                 # vstacked upsample-gather
    for k in range(NT):
        u3cat[k * n_p:(k + 1) * n_p, :HW] = (bmat @ s3_np[k]).T

    # ---- block-diagonal (over batch) channel-mix weights ----
    eyeB = jnp.eye(B, dtype=jnp.float32)

    def bdiag(w_t):                      # (out, in) -> (B*out, B*in)
        return jnp.kron(eyeB, w_t)

    def brep(b_vec, n_out):              # (1, n_out) -> (B*n_out, 1)
        return jnp.tile(b_vec.reshape(n_out, 1), (B, 1))

    w1bd = bdiag(params["w1"].T)                                  # (BF, BC)
    wfbd = bdiag(params["wf"].T)                                  # (BF, BF)
    w4bd = bdiag(params["w4"].T)                                  # (BC, BF)
    b1bd = brep(params["b1"], F)
    bfbd = brep(params["bf"], F)
    b2bd = brep(params["b2"], F)
    b3bd = brep(params["b3"], F)
    b4bd = brep(params["b4"], C)

    w2r = params["w2"].reshape(NT, F, F)                          # HWIO -> (tap, in, out)
    w3r = params["w3"].reshape(NT, F, F)
    w2cat = jnp.concatenate([bdiag(w2r[k].T) for k in range(NT)], axis=1)   # (BF, NT*BF)
    w3vs = jnp.concatenate([bdiag(w3r[k].T) for k in range(NT)], axis=0)    # (NT*BF, BF)

    # conv_f fused into conv1: rows 0:BF -> c1_, rows BF:2BF -> cf.
    wtop = jnp.concatenate([w1bd, wfbd @ w1bd], axis=0)                     # (2BF, BC)
    btop = jnp.concatenate([b1bd, wfbd @ b1bd + bfbd], axis=0)              # (2BF, 1)

    bf16 = jnp.bfloat16
    # NCHW -> (B*C, HWp): channels on sublanes, spatial on lanes (lane padded).
    x_flat = x_nchw.reshape(B * C, HW).astype(jnp.float32)
    x_pad = jnp.pad(x_flat, ((0, 0), (0, HWp - HW)))

    out_pad = pl.pallas_call(
        esa_kernel,
        out_shape=jax.ShapeDtypeStruct((B * C, HWp), jnp.float32),
        compiler_params=pltpu.CompilerParams(vmem_limit_bytes=32 * 1024 * 1024),
    )(x_pad,
      wtop.astype(bf16), btop,
      w2cat.astype(bf16), b2bd,
      w3vs.astype(bf16), b3bd,
      w4bd.astype(bf16), b4bd,
      jnp.asarray(s2cat, bf16), jnp.asarray(pmask), jnp.asarray(u3cat, bf16))

    return out_pad[:, :HW].reshape(B, C, H, W)


# ---------------------------------------------------------------------------
# pure-JAX reference (lax.conv / reduce_window, f32) for validation
# ---------------------------------------------------------------------------
def esa_reference(x_nchw, params):
    B, C, H, W = x_nchw.shape
    F = params["w1"].shape[1]
    x = jnp.transpose(x_nchw, (0, 2, 3, 1))                      # NHWC
    dn = ("NHWC", "HWIO", "NHWC")

    def conv(inp, w_hwio, b, stride, padding):
        y = jax.lax.conv_general_dilated(inp, w_hwio, (stride, stride), padding,
                                         dimension_numbers=dn)
        return y + b.reshape(1, 1, 1, -1)

    c1_ = conv(x, params["w1"].reshape(1, 1, C, F), params["b1"], 1, "VALID")
    c1 = conv(c1_, params["w2"], params["b2"], 2, "VALID")
    vmax = jax.lax.reduce_window(c1, -jnp.inf, jax.lax.max,
                                 (1, 7, 7, 1), (1, 3, 3, 1), "VALID")
    c3 = conv(vmax, params["w3"], params["b3"], 1, ((1, 1), (1, 1)))
    Hp, Wp = c3.shape[1], c3.shape[2]
    BH = jnp.asarray(bilinear_matrix(H, Hp))
    BW = jnp.asarray(bilinear_matrix(W, Wp))
    c3u = jnp.einsum("Yh,bhwf,Xw->bYXf", BH, c3, BW)             # bilinear upsample
    cf = conv(c1_, params["wf"].reshape(1, 1, F, F), params["bf"], 1, "VALID")
    c4 = conv(c3u + cf, params["w4"].reshape(1, 1, F, C), params["b4"], 1, "VALID")
    m = jax.nn.sigmoid(c4)
    return jnp.transpose(x * m, (0, 3, 1, 2))


if __name__ == "__main__":
    # n_feats = 8, esa_channels = 4, H = W = 24 (conv2 -> 11x11, pool -> 2x2)
    B, C, F, H, W = 2, 8, 4, 24, 24

    key = jax.random.PRNGKey(0)
    keys = jax.random.split(key, 11)
    params = {
        "w1": jax.random.normal(keys[0], (C, F), jnp.float32) * 0.2,
        "b1": jax.random.normal(keys[1], (1, F), jnp.float32) * 0.1,
        "w2": jax.random.normal(keys[2], (3, 3, F, F), jnp.float32) * 0.2,
        "b2": jax.random.normal(keys[3], (1, F), jnp.float32) * 0.1,
        "w3": jax.random.normal(keys[4], (3, 3, F, F), jnp.float32) * 0.2,
        "b3": jax.random.normal(keys[5], (1, F), jnp.float32) * 0.1,
        "wf": jax.random.normal(keys[6], (F, F), jnp.float32) * 0.2,
        "bf": jax.random.normal(keys[7], (1, F), jnp.float32) * 0.1,
        "w4": jax.random.normal(keys[8], (F, C), jnp.float32) * 0.2,
        "b4": jax.random.normal(keys[9], (1, C), jnp.float32) * 0.1,
    }
    x = jax.random.normal(keys[10], (B, C, H, W), jnp.float32)

    esa_fn = jax.jit(esa_pallas)
    out = esa_fn(x, params)
    jax.block_until_ready(out)

    # bf16 MXU operands (f32 accumulation) vs. a pure-f32 lax.conv reference:
    # tolerance relaxed to 2e-2 accordingly.
    ref = esa_reference(x, params)
    np.testing.assert_allclose(np.asarray(out), np.asarray(ref), rtol=2e-2, atol=2e-2)
    print("KERNEL_OK")
</pallas_src>

<mosaic_0001>
module attributes {stable_mosaic.version = 11 : i64} {
  func.func @esa_kernel(%arg0: memref<16x640xf32, #tpu.memory_space<vmem>>, %arg1: memref<16x16xbf16, #tpu.memory_space<vmem>>, %arg2: memref<16x1xf32, #tpu.memory_space<vmem>>, %arg3: memref<8x72xbf16, #tpu.memory_space<vmem>>, %arg4: memref<8x1xf32, #tpu.memory_space<vmem>>, %arg5: memref<72x8xbf16, #tpu.memory_space<vmem>>, %arg6: memref<8x1xf32, #tpu.memory_space<vmem>>, %arg7: memref<16x8xbf16, #tpu.memory_space<vmem>>, %arg8: memref<16x1xf32, #tpu.memory_space<vmem>>, %arg9: memref<640x1152xbf16, #tpu.memory_space<vmem>>, %arg10: memref<4x128xf32, #tpu.memory_space<vmem>>, %arg11: memref<36x640xbf16, #tpu.memory_space<vmem>>, %arg12: memref<16x640xf32, #tpu.memory_space<vmem>>) attributes {dimension_semantics = [], scalar_prefetch = 0 : i64, scratch_operands = 0 : i64, tpu.core_type = #tpu.core_type<tc>} {
    %c0 = arith.constant 0 : index
    %c0_0 = arith.constant 0 : index
    %0 = vector.load %arg0[%c0, %c0_0] : memref<16x640xf32, #tpu.memory_space<vmem>>, vector<16x640xf32>
    %c0_1 = arith.constant 0 : index
    %c0_2 = arith.constant 0 : index
    %1 = vector.load %arg1[%c0_1, %c0_2] : memref<16x16xbf16, #tpu.memory_space<vmem>>, vector<16x16xbf16>
    %2 = arith.truncf %0 : vector<16x640xf32> to vector<16x640xbf16>
    %cst = arith.constant dense<0.000000e+00> : vector<16x640xf32>
    %3 = tpu.matmul %1, %2, %cst {dimension_numbers = #tpu.dot_dimension_numbers<[1], [0], [0], [1], [0, 0, 1, 1], [], []>} : vector<16x16xbf16>, vector<16x640xbf16>, vector<16x640xf32> -> vector<16x640xf32>
    %c0_3 = arith.constant 0 : index
    %c0_4 = arith.constant 0 : index
    %4 = vector.load %arg2[%c0_3, %c0_4] : memref<16x1xf32, #tpu.memory_space<vmem>>, vector<16x1xf32>
    %5 = vector.broadcast %4 : vector<16x1xf32> to vector<16x640xf32>
    %6 = arith.addf %3, %5 : vector<16x640xf32>
    %7 = vector.extract_strided_slice %6 {offsets = [0, 0], sizes = [8, 640], strides = [1, 1]} : vector<16x640xf32> to vector<8x640xf32>
    %8 = vector.extract_strided_slice %6 {offsets = [8, 0], sizes = [8, 640], strides = [1, 1]} : vector<16x640xf32> to vector<8x640xf32>
    %9 = arith.truncf %7 : vector<8x640xf32> to vector<8x640xbf16>
    %c0_5 = arith.constant 0 : index
    %c0_6 = arith.constant 0 : index
    %10 = vector.load %arg9[%c0_5, %c0_6] : memref<640x1152xbf16, #tpu.memory_space<vmem>>, vector<640x1152xbf16>
    %cst_7 = arith.constant dense<0.000000e+00> : vector<8x1152xf32>
    %11 = tpu.matmul %9, %10, %cst_7 {dimension_numbers = #tpu.dot_dimension_numbers<[1], [0], [0], [1], [0, 0, 1, 1], [], []>} : vector<8x640xbf16>, vector<640x1152xbf16>, vector<8x1152xf32> -> vector<8x1152xf32>
    %12 = vector.extract_strided_slice %11 {offsets = [0, 0], sizes = [8, 128], strides = [1, 1]} : vector<8x1152xf32> to vector<8x128xf32>
    %13 = vector.extract_strided_slice %11 {offsets = [0, 128], sizes = [8, 128], strides = [1, 1]} : vector<8x1152xf32> to vector<8x128xf32>
    %14 = vector.extract_strided_slice %11 {offsets = [0, 256], sizes = [8, 128], strides = [1, 1]} : vector<8x1152xf32> to vector<8x128xf32>
    %15 = vector.extract_strided_slice %11 {offsets = [0, 384], sizes = [8, 128], strides = [1, 1]} : vector<8x1152xf32> to vector<8x128xf32>
    %16 = vector.extract_strided_slice %11 {offsets = [0, 512], sizes = [8, 128], strides = [1, 1]} : vector<8x1152xf32> to vector<8x128xf32>
    %17 = vector.extract_strided_slice %11 {offsets = [0, 640], sizes = [8, 128], strides = [1, 1]} : vector<8x1152xf32> to vector<8x128xf32>
    %18 = vector.extract_strided_slice %11 {offsets = [0, 768], sizes = [8, 128], strides = [1, 1]} : vector<8x1152xf32> to vector<8x128xf32>
    %19 = vector.extract_strided_slice %11 {offsets = [0, 896], sizes = [8, 128], strides = [1, 1]} : vector<8x1152xf32> to vector<8x128xf32>
    %20 = vector.extract_strided_slice %11 {offsets = [0, 1024], sizes = [8, 128], strides = [1, 1]} : vector<8x1152xf32> to vector<8x128xf32>
    %21 = tpu.concatenate %12, %13, %14, %15, %16, %17, %18, %19, %20 in 0 : vector<8x128xf32>, vector<8x128xf32>, vector<8x128xf32>, vector<8x128xf32>, vector<8x128xf32>, vector<8x128xf32>, vector<8x128xf32>, vector<8x128xf32>, vector<8x128xf32> -> vector<72x128xf32>
    %c0_8 = arith.constant 0 : index
    %c0_9 = arith.constant 0 : index
    %22 = vector.load %arg3[%c0_8, %c0_9] : memref<8x72xbf16, #tpu.memory_space<vmem>>, vector<8x72xbf16>
    %23 = arith.truncf %21 : vector<72x128xf32> to vector<72x128xbf16>
    %cst_10 = arith.constant dense<0.000000e+00> : vector<8x128xf32>
    %24 = tpu.matmul %22, %23, %cst_10 {dimension_numbers = #tpu.dot_dimension_numbers<[1], [0], [0], [1], [0, 0, 1, 1], [], []>} : vector<8x72xbf16>, vector<72x128xbf16>, vector<8x128xf32> -> vector<8x128xf32>
    %c0_11 = arith.constant 0 : index
    %c0_12 = arith.constant 0 : index
    %25 = vector.load %arg4[%c0_11, %c0_12] : memref<8x1xf32, #tpu.memory_space<vmem>>, vector<8x1xf32>
    %26 = vector.broadcast %25 : vector<8x1xf32> to vector<8x128xf32>
    %27 = arith.addf %24, %26 : vector<8x128xf32>
    %c0_13 = arith.constant 0 : index
    %c0_14 = arith.constant 0 : index
    %28 = vector.load %arg10[%c0_13, %c0_14] : memref<4x128xf32, #tpu.memory_space<vmem>>, vector<4x128xf32>
    %29 = vector.shape_cast %28 : vector<4x128xf32> to vector<1x4x128xf32>
    %cst_15 = arith.constant 5.000000e-01 : f32
    %30 = vector.broadcast %cst_15 : f32 to vector<1x4x128xf32>
    %31 = arith.cmpf ogt, %29, %30 : vector<1x4x128xf32>
    %32 = vector.shape_cast %27 : vector<8x128xf32> to vector<8x1x128xf32>
    %cst_16 = arith.constant 0xFF800000 : f32
    %33 = vector.shape_cast %31 : vector<1x4x128xi1> to vector<1x4x128xi1>
    %34 = vector.broadcast %33 : vector<1x4x128xi1> to vector<8x4x128xi1>
    %35 = vector.shape_cast %32 : vector<8x1x128xf32> to vector<8x1x128xf32>
    %36 = vector.broadcast %35 : vector<8x1x128xf32> to vector<8x4x128xf32>
    %37 = vector.broadcast %cst_16 : f32 to vector<8x4x128xf32>
    %38 = arith.select %34, %36, %37 : vector<8x4x128xi1>, vector<8x4x128xf32>
    %cst_17 = arith.constant dense<0xFF800000> : vector<8x4xf32>
    %39 = vector.multi_reduction <maximumf>, %38, %cst_17 [2] : vector<8x4x128xf32> to vector<8x4xf32>
    %c0_18 = arith.constant 0 : index
    %c0_19 = arith.constant 0 : index
    %40 = vector.load %arg5[%c0_18, %c0_19] : memref<72x8xbf16, #tpu.memory_space<vmem>>, vector<72x8xbf16>
    %41 = arith.truncf %39 : vector<8x4xf32> to vector<8x4xbf16>
    %cst_20 = arith.constant dense<0.000000e+00> : vector<72x4xf32>
    %42 = tpu.matmul %40, %41, %cst_20 {dimension_numbers = #tpu.dot_dimension_numbers<[1], [0], [0], [1], [0, 0, 1, 1], [], []>} : vector<72x8xbf16>, vector<8x4xbf16>, vector<72x4xf32> -> vector<72x4xf32>
    %43 = vector.extract_strided_slice %42 {offsets = [0, 0], sizes = [8, 4], strides = [1, 1]} : vector<72x4xf32> to vector<8x4xf32>
    %44 = vector.extract_strided_slice %42 {offsets = [8, 0], sizes = [8, 4], strides = [1, 1]} : vector<72x4xf32> to vector<8x4xf32>
    %45 = vector.extract_strided_slice %42 {offsets = [16, 0], sizes = [8, 4], strides = [1, 1]} : vector<72x4xf32> to vector<8x4xf32>
    %46 = vector.extract_strided_slice %42 {offsets = [24, 0], sizes = [8, 4], strides = [1, 1]} : vector<72x4xf32> to vector<8x4xf32>
    %47 = vector.extract_strided_slice %42 {offsets = [32, 0], sizes = [8, 4], strides = [1, 1]} : vector<72x4xf32> to vector<8x4xf32>
    %48 = vector.extract_strided_slice %42 {offsets = [40, 0], sizes = [8, 4], strides = [1, 1]} : vector<72x4xf32> to vector<8x4xf32>
    %49 = vector.extract_strided_slice %42 {offsets = [48, 0], sizes = [8, 4], strides = [1, 1]} : vector<72x4xf32> to vector<8x4xf32>
    %50 = vector.extract_strided_slice %42 {offsets = [56, 0], sizes = [8, 4], strides = [1, 1]} : vector<72x4xf32> to vector<8x4xf32>
    %51 = vector.extract_strided_slice %42 {offsets = [64, 0], sizes = [8, 4], strides = [1, 1]} : vector<72x4xf32> to vector<8x4xf32>
    %52 = tpu.concatenate %43, %44, %45, %46, %47, %48, %49, %50, %51 in 1 : vector<8x4xf32>, vector<8x4xf32>, vector<8x4xf32>, vector<8x4xf32>, vector<8x4xf32>, vector<8x4xf32>, vector<8x4xf32>, vector<8x4xf32>, vector<8x4xf32> -> vector<8x36xf32>
    %53 = arith.truncf %52 : vector<8x36xf32> to vector<8x36xbf16>
    %c0_21 = arith.constant 0 : index
    %c0_22 = arith.constant 0 : index
    %54 = vector.load %arg11[%c0_21, %c0_22] : memref<36x640xbf16, #tpu.memory_space<vmem>>, vector<36x640xbf16>
    %cst_23 = arith.constant dense<0.000000e+00> : vector<8x640xf32>
    %55 = tpu.matmul %53, %54, %cst_23 {dimension_numbers = #tpu.dot_dimension_numbers<[1], [0], [0], [1], [0, 0, 1, 1], [], []>} : vector<8x36xbf16>, vector<36x640xbf16>, vector<8x640xf32> -> vector<8x640xf32>
    %c0_24 = arith.constant 0 : index
    %c0_25 = arith.constant 0 : index
    %56 = vector.load %arg6[%c0_24, %c0_25] : memref<8x1xf32, #tpu.memory_space<vmem>>, vector<8x1xf32>
    %57 = vector.broadcast %56 : vector<8x1xf32> to vector<8x640xf32>
    %58 = arith.addf %55, %57 : vector<8x640xf32>
    %c0_26 = arith.constant 0 : index
    %c0_27 = arith.constant 0 : index
    %59 = vector.load %arg7[%c0_26, %c0_27] : memref<16x8xbf16, #tpu.memory_space<vmem>>, vector<16x8xbf16>
    %60 = arith.addf %58, %8 : vector<8x640xf32>
    %61 = arith.truncf %60 : vector<8x640xf32> to vector<8x640xbf16>
    %cst_28 = arith.constant dense<0.000000e+00> : vector<16x640xf32>
    %62 = tpu.matmul %59, %61, %cst_28 {dimension_numbers = #tpu.dot_dimension_numbers<[1], [0], [0], [1], [0, 0, 1, 1], [], []>} : vector<16x8xbf16>, vector<8x640xbf16>, vector<16x640xf32> -> vector<16x640xf32>
    %c0_29 = arith.constant 0 : index
    %c0_30 = arith.constant 0 : index
    %63 = vector.load %arg8[%c0_29, %c0_30] : memref<16x1xf32, #tpu.memory_space<vmem>>, vector<16x1xf32>
    %64 = vector.broadcast %63 : vector<16x1xf32> to vector<16x640xf32>
    %65 = arith.addf %62, %64 : vector<16x640xf32>
    %cst_31 = arith.constant 0.000000e+00 : f32
    %66 = vector.broadcast %cst_31 : f32 to vector<16x640xf32>
    %67 = arith.subf %66, %65 : vector<16x640xf32>
    %68 = math.exp %67 : vector<16x640xf32>
    %cst_32 = arith.constant 1.000000e+00 : f32
    %69 = vector.broadcast %cst_32 : f32 to vector<16x640xf32>
    %70 = arith.addf %69, %68 : vector<16x640xf32>
    %71 = tpu.reciprocal %70 {approx = true} : vector<16x640xf32> -> vector<16x640xf32>
    %72 = arith.mulf %0, %71 : vector<16x640xf32>
    %c0_33 = arith.constant 0 : index
    %c0_34 = arith.constant 0 : index
    %73 = vector.load %arg12[%c0_33, %c0_34] : memref<16x640xf32, #tpu.memory_space<vmem>>, vector<16x640xf32>
    tpu.vector_store %arg12[%c0_33, %c0_34], %72 {strides = array<i32>} : memref<16x640xf32, #tpu.memory_space<vmem>>, vector<16x640xf32>,
    return
  }
}

</mosaic_0001>

<bundles_post_ra>
// kernel: esa_pallas.1
= control target key start
LH: loop header
LB: loop body
LE: loop exit
PB: predicated region body
PF: predicated region fallthrough
CT: control target
= control target key end

     0   :  { %v5163_v3 = vmov 0   ;;  %vm76_vm0 = vcmask 130048   ;;  %v5164_v17 = vmov 0.0   ;;  %vm5165_vm1 = vmmov 0   ;;  %s5167_s20 = smov 4   ;;  %s5168_s21 = smov 8   ;;  %s6665_s0 = inlined_call_operand.vmem [shape: f32[16,640], index: 0, kind: input, shape index: {}]   ;;  %s6666_s1 = inlined_call_operand.vmem [shape: bf16[16,16], index: 1, kind: input, shape index: {}]   ;;  %s6667_s2 = inlined_call_operand.vmem [shape: f32[16,1], index: 2, kind: input, shape index: {}]   ;;  %s6668_s4 = inlined_call_operand.vmem [shape: f32[8,1], index: 4, kind: input, shape index: {}]   ;;  %s6669_s9 = inlined_call_operand.vmem [shape: bf16[640,1152], index: 9, kind: input, shape index: {}]   ;;  %s6670_s3 = inlined_call_operand.vmem [shape: bf16[8,72], index: 3, kind: input, shape index: {}]   ;;  %s6671_s10 = inlined_call_operand.vmem [shape: f32[4,128], index: 10, kind: input, shape index: {}]   ;;  %s6672_s5 = inlined_call_operand.vmem [shape: bf16[72,8], index: 5, kind: input, shape index: {}]   ;;  %s6673_s11 = inlined_call_operand.vmem [shape: bf16[36,640], index: 11, kind: input, shape index: {}]   ;;  %s6674_s8 = inlined_call_operand.vmem [shape: f32[16,1], index: 8, kind: input, shape index: {}]   ;;  %s6675_s6 = inlined_call_operand.vmem [shape: f32[8,1], index: 6, kind: input, shape index: {}]   ;;  %s6676_s7 = inlined_call_operand.vmem [shape: bf16[16,8], index: 7, kind: input, shape index: {}]   ;;  %s6677_s12 = inlined_call_operand.vmem [shape: f32[16,640], index: 12, kind: output, shape index: {}]  }
   0x1   :  { %v43_v0 = vld [vmem:[%s6665_s0 + $0x8] sm:$0xff]  ;;  %v48_v1 = vld [vmem:[%s6665_s0 + $0x30] sm:$0xff]  ;;  %v45_v2 = vld [vmem:[%s6665_s0 + $0x18] sm:$0xff]  ;;  %112 = vmatprep.mubr.bf16.mxu0 %v5163_v3  ;;  %155 = vmatprep.mubr.bf16.mxu1 %v5163_v3  ;;  %vm3080_vm2 = vcmask 1043456   ;;  %vm3076_vm3 = vcmask 588800   ;;  %vm3340_vm5 = vcmask 1041409  }
   0x2   :  { %v55_v4 = vpack.c.bf16 %v48_v1, %v43_v0  ;;  %v50_v5 = vld [vmem:[%s6665_s0 + $0x40] sm:$0xff]  ;;  %v47_v7 = vld [vmem:[%s6665_s0 + $0x28] sm:$0xff]  ;;  %4565 = vset.pattern.permute.xlu0 %v5163_v3  ;;  %4566 = vset.pattern.permute.xlu1 %v5163_v3  ;;  %v44_v10 = vld [vmem:[%s6665_s0 + $0x10] sm:$0xff]  ;;  %vm3342_vm6 = vcmask 1042434   ;;  %vm3344_vm7 = vcmask 1043459   ;;  %vm3346_vm8 = vcmask 1044484  }
   0x3   :  { %v42_v6 = vld [vmem:[%s6665_s0] sm:$0xff]  ;;  %v57_v8 = vpack.c.bf16 %v50_v5, %v45_v2  ;;  %v49_v11 = vld [vmem:[%s6665_s0 + $0x38] sm:$0xff]  ;;  %v51_v15 = vld [vmem:[%s6665_s0 + $0x48] sm:$0xff]  ;;  %vm3348_vm9 = vcmask 1045509   ;;  %vm3350_vm10 = vcmask 1046534   ;;  %vm3352_vm11 = vcmask 1047559  }
   0x4   :  { %v54_v9 = vpack.c.bf16 %v47_v7, %v42_v6  ;;  %80 = vmatprep.subr.bf16.mxu0 %v55_v4  ;;  %v56_v12 = vpack.c.bf16 %v49_v11, %v44_v10  ;;  %v4567_v13 = vld [vmem:[%s6666_s1] sm:$0xff]   ;;  %v4573_v22 = vld [vmem:[%s6669_s9 + $0xc] ss:$36 sps:$4 sm:$0xff]   ;;  %v4582_v26 = vld [vmem:[%s6669_s9 + $0x94] ss:$36 sps:$4 sm:$0xff]   ;;  %vm3355_vm12 = vcmask 64512  }
   0x5   :  { %v46_v14 = vld [vmem:[%s6665_s0 + $0x20] sm:$0xff]  ;;  %123 = vmatprep.subr.bf16.mxu1 %v57_v8  ;;  %v4576_v23 = vld [vmem:[%s6669_s9 + $0x4c] ss:$36 sps:$4 sm:$0xff]   ;;  %v4579_v27 = vld [vmem:[%s6669_s9 + $0x54] ss:$36 sps:$4 sm:$0xff]   ;;  %s5169_s25 = smov 12  }
   0x6   :  { %81 = vmatpush1.bf16.msra.mxu0 %v54_v9  ;;  %v59_v16 = vld [vmem:[%s6667_s2] sm:$0xff]  ;;  %124 = vmatpush1.bf16.msra.mxu1 %v56_v12  ;;  %v58_v18 = vpack.c.bf16 %v51_v15, %v46_v14  ;;  %v4574_v24 = vld [vmem:[%s6669_s9 + $0x48] ss:$36 sps:$4 sm:$0xff]   ;;  %v4580_v28 = vld [vmem:[%s6669_s9 + $0x90] ss:$36 sps:$4 sm:$0xff]   ;;  %vm3583_vm13 = vcmask 1041408  }
   0x7   :  { %4443 = vmatprep.subr.bf16.mxu0 %v5164_v17  ;;  %v3070_v19 = vld [vmem:[%s6668_s4] sm:$0xff]  ;;  %63 = vperm.xlu0 %4565, %v59_v16   ;;  %v4571_v25 = vld [vmem:[%s6669_s9 + $0x8] ss:$36 sps:$4 sm:$0xff]   ;;  %v4577_v29 = vld [vmem:[%s6669_s9 + $0x50] ss:$36 sps:$4 sm:$0xff]   ;;  %s5170_s29 = smov 16  }
   0x8   :  { %v4570_v20 = vld [vmem:[%s6669_s9 + $0x4] ss:$36 sps:$4 sm:$0xff]   ;;  %v4588_v30 = vld [vmem:[%s6669_s9 + $0xdc] ss:$36 sps:$4 sm:$0xff]   ;;  %v4600_v38 = vld [vmem:[%s6669_s9 + $0x16c] ss:$36 sps:$4 sm:$0xff]  }
   0x9   :  { %3970 = vmatmul.mubr.msk.bf16.vlgmr.msra.gmra.mrb[0].mxu0 %vm76_vm0, %v4567_v13  ;;  %v4568_v21 = vld [vmem:[%s6669_s9] ss:$36 sps:$4 sm:$0xff]   ;;  %3971 = vmatmul.mubr.msk.bf16.vlgmr.msra.gmra.mrb[0].mxu1 %vm76_vm0, %v4567_v13  ;;  %v4586_v32 = vld [vmem:[%s6669_s9 + $0xd8] ss:$36 sps:$4 sm:$0xff]   ;;  %v4597_v39 = vld [vmem:[%s6669_s9 + $0x12c] ss:$36 sps:$4 sm:$0xff]  }
   0xa   :  { %4444 = vmatpush3.bf16.msra.mxu0 %v58_v18  ;;  %4445 = vmatprep.mubr.msk.bf16.mxu0 %vm5165_vm1, %v5164_v17  ;;  %v4585_v31 = vld [vmem:[%s6669_s9 + $0x9c] ss:$36 sps:$4 sm:$0xff]   ;;  %v4594_v34 = vld [vmem:[%s6669_s9 + $0x124] ss:$36 sps:$4 sm:$0xff]   ;;  %v4606_v42 = vld [vmem:[%s6669_s9 + $0x1b4] ss:$36 sps:$4 sm:$0xff]  }
   0xb   :  { %2452 = vmatprep.subr.bf16.mxu1 %v4570_v20  ;;  %3073 = vperm.xlu0 %4565, %v3070_v19   ;;  %v4583_v33 = vld [vmem:[%s6669_s9 + $0x98] ss:$36 sps:$4 sm:$0xff]   ;;  %v4591_v35 = vld [vmem:[%s6669_s9 + $0xe4] ss:$36 sps:$4 sm:$0xff]   ;;  %v4604_v44 = vld [vmem:[%s6669_s9 + $0x1b0] ss:$36 sps:$4 sm:$0xff]  }
   0xc   :  { %2575 = vmatprep.subr.bf16.mxu0 %v4573_v22  ;;  %2453 = vmatpush1.bf16.msra.mxu1 %v4568_v21  ;;  %v4592_v36 = vld [vmem:[%s6669_s9 + $0x120] ss:$36 sps:$4 sm:$0xff]   ;;  %v4598_v40 = vld [vmem:[%s6669_s9 + $0x168] ss:$36 sps:$4 sm:$0xff]   ;;  %v4603_v43 = vld [vmem:[%s6669_s9 + $0x174] ss:$36 sps:$4 sm:$0xff]  }
   0xd   :  { %2454 = vmatprep.subr.bf16.mxu1 %v4576_v23  ;;  %v4589_v37 = vld [vmem:[%s6669_s9 + $0xe0] ss:$36 sps:$4 sm:$0xff]   ;;  %v4595_v41 = vld [vmem:[%s6669_s9 + $0x128] ss:$36 sps:$4 sm:$0xff]   ;;  %v4601_v45 = vld [vmem:[%s6669_s9 + $0x170] ss:$36 sps:$4 sm:$0xff]  }
   0xe   :  { %v4612_v46 = vld [vmem:[%s6669_s9 + $0x1fc] ss:$36 sps:$4 sm:$0xff]   ;;  %v4618_v50 = vld [vmem:[%s6669_s9 + $0x244] ss:$36 sps:$4 sm:$0xff]   ;;  %v4624_v54 = vld [vmem:[%s6669_s9 + $0x28c] ss:$36 sps:$4 sm:$0xff]  }
   0xf   :  { %v4609_v47 = vld [vmem:[%s6669_s9 + $0x1bc] ss:$36 sps:$4 sm:$0xff]   ;;  %v4615_v51 = vld [vmem:[%s6669_s9 + $0x204] ss:$36 sps:$4 sm:$0xff]   ;;  %v4621_v55 = vld [vmem:[%s6669_s9 + $0x24c] ss:$36 sps:$4 sm:$0xff]  }
  0x10   :  { %2455 = vmatpush1.bf16.msra.mxu1 %v4574_v24  ;;  %v4610_v48 = vld [vmem:[%s6669_s9 + $0x1f8] ss:$36 sps:$4 sm:$0xff]   ;;  %v4616_v52 = vld [vmem:[%s6669_s9 + $0x240] ss:$36 sps:$4 sm:$0xff]   ;;  %v4619_v56 = vld [vmem:[%s6669_s9 + $0x248] ss:$36 sps:$4 sm:$0xff]  }
  0x11   :  { %4446 = vmatmul.mubr.msk.bf16.vlgmr.msra.gmra.mrb[4].mxu0 %vm76_vm0, %v4567_v13  ;;  %2456 = vmatprep.subr.bf16.mxu1 %v4582_v26  ;;  %v4607_v49 = vld [vmem:[%s6669_s9 + $0x1b8] ss:$36 sps:$4 sm:$0xff]   ;;  %v4613_v53 = vld [vmem:[%s6669_s9 + $0x200] ss:$36 sps:$4 sm:$0xff]   ;;  %v4622_v57 = vld [vmem:[%s6669_s9 + $0x288] ss:$36 sps:$4 sm:$0xff]  }
  0x12   :  { %2576 = vmatpush1.bf16.msra.mxu0 %v4571_v25  ;;  %v4627_v58 = vld [vmem:[%s6669_s9 + $0x294] ss:$36 sps:$4 sm:$0xff]   ;;  %v4636_v62 = vld [vmem:[%s6669_s9 + $0x31c] ss:$36 sps:$4 sm:$0xff]   ;;  %v4642_v2 = vld [vmem:[%s6669_s9 + $0x364] ss:$36 sps:$4 sm:$0xff]  }
  0x13   :  { %2577 = vmatprep.subr.bf16.mxu0 %v4579_v27  ;;  %v4630_v59 = vld [vmem:[%s6669_s9 + $0x2d4] ss:$36 sps:$4 sm:$0xff]   ;;  %v4633_v63 = vld [vmem:[%s6669_s9 + $0x2dc] ss:$36 sps:$4 sm:$0xff]   ;;  %v4639_v4 = vld [vmem:[%s6669_s9 + $0x324] ss:$36 sps:$4 sm:$0xff]  }
  0x14   :  { %2457 = vmatpush1.bf16.msra.mxu1 %v4580_v28  ;;  %v4628_v60 = vld [vmem:[%s6669_s9 + $0x2d0] ss:$36 sps:$4 sm:$0xff]   ;;  %v4634_v0 = vld [vmem:[%s6669_s9 + $0x318] ss:$36 sps:$4 sm:$0xff]   ;;  %v4640_v5 = vld [vmem:[%s6669_s9 + $0x360] ss:$36 sps:$4 sm:$0xff]  }
  0x15   :  { %2458 = vmatprep.subr.bf16.mxu1 %v4588_v30  ;;  %v4625_v61 = vld [vmem:[%s6669_s9 + $0x290] ss:$36 sps:$4 sm:$0xff]   ;;  %v4631_v1 = vld [vmem:[%s6669_s9 + $0x2d8] ss:$36 sps:$4 sm:$0xff]   ;;  %v4637_v6 = vld [vmem:[%s6669_s9 + $0x320] ss:$36 sps:$4 sm:$0xff]  }
  0x16   :  { %2578 = vmatpush1.bf16.msra.mxu0 %v4577_v29  ;;  %v4648_v7 = vld [vmem:[%s6669_s9 + $0x3ac] ss:$36 sps:$4 sm:$0xff]   ;;  %v4654_v11 = vld [vmem:[%s6669_s9 + $0x3f4] ss:$36 sps:$4 sm:$0xff]   ;;  %v4657_v15 = vld [vmem:[%s6669_s9 + $0x3fc] ss:$36 sps:$4 sm:$0xff]  }
  0x17   :  { %2579 = vmatprep.subr.bf16.mxu0 %v4585_v31  ;;  %v4645_v8 = vld [vmem:[%s6669_s9 + $0x36c] ss:$36 sps:$4 sm:$0xff]   ;;  %v4651_v12 = vld [vmem:[%s6669_s9 + $0x3b4] ss:$36 sps:$4 sm:$0xff]   ;;  %v4660_v18 = vld [vmem:[%s6669_s9 + $0x43c] ss:$36 sps:$4 sm:$0xff]  }
  0x18   :  { %2459 = vmatpush1.bf16.msra.mxu1 %v4586_v32  ;;  %v4646_v9 = vld [vmem:[%s6669_s9 + $0x3a8] ss:$36 sps:$4 sm:$0xff]   ;;  %v4652_v13 = vld [vmem:[%s6669_s9 + $0x3f0] ss:$36 sps:$4 sm:$0xff]   ;;  %v4655_v16 = vld [vmem:[%s6669_s9 + $0x3f8] ss:$36 sps:$4 sm:$0xff]  }
  0x19   :  { %2460 = vmatprep.subr.bf16.mxu1 %v4594_v34  ;;  %v4643_v10 = vld [vmem:[%s6669_s9 + $0x368] ss:$36 sps:$4 sm:$0xff]   ;;  %v4649_v14 = vld [vmem:[%s6669_s9 + $0x3b0] ss:$36 sps:$4 sm:$0xff]   ;;  %v4658_v20 = vld [vmem:[%s6669_s9 + $0x438] ss:$36 sps:$4 sm:$0xff]  }
  0x1a   :  { %2580 = vmatpush1.bf16.msra.mxu0 %v4583_v33  ;;  %v4663_v19 = vld [vmem:[%s6669_s9 + $0x444] ss:$36 sps:$4 sm:$0xff]   ;;  %v4669_v23 = vld [vmem:[%s6669_s9 + $0x48c] ss:$36 sps:$4 sm:$0xff]   ;;  %s5172_s14 = smov 24   ;;  %s5173_s15 = smov 28  }
  0x1b   :  { %2581 = vmatprep.subr.bf16.mxu0 %v4591_v35  ;;  %v4661_v21 = vld [vmem:[%s6669_s9 + $0x440] ss:$36 sps:$4 sm:$0xff]   ;;  %s5174_s19 = smov 32   ;;  %vm3478_vm14 = vcmask 31744   ;;  %vm3481_vm15 = vcmask 97280  }
  0x1c   :  { %2461 = vmatpush1.bf16.msra.mxu1 %v4592_v36  ;;  %v4666_v22 = vld [vmem:[%s6669_s9 + $0x484] ss:$36 sps:$4 sm:$0xff]  }
  0x1d   :  { %2462 = vmatprep.subr.bf16.mxu1 %v4600_v38  ;;  %v4664_v36 = vld [vmem:[%s6669_s9 + $0x480] ss:$36 sps:$4 sm:$0xff]  }
  0x1e   :  { %2582 = vmatpush1.bf16.msra.mxu0 %v4589_v37  ;;  %v4667_v37 = vld [vmem:[%s6669_s9 + $0x488] ss:$36 sps:$4 sm:$0xff]  }
  0x1f   :  { %2583 = vmatprep.subr.bf16.mxu0 %v4597_v39 }
  0x20   :  { %2463 = vmatpush1.bf16.msra.mxu1 %v4598_v40  ;;  %v4672_v40 = vld [vmem:[%s6669_s9 + $0x4cc] ss:$36 sps:$4 sm:$0xff]  }
  0x21   :  { %2464 = vmatprep.subr.bf16.mxu1 %v4606_v42 }
  0x22   :  { %2584 = vmatpush1.bf16.msra.mxu0 %v4595_v41  ;;  %v4675_v41 = vld [vmem:[%s6669_s9 + $0x4d4] ss:$36 sps:$4 sm:$0xff]  }
  0x23   :  { %2585 = vmatprep.subr.bf16.mxu0 %v4603_v43 }
  0x24   :  { %2465 = vmatpush1.bf16.msra.mxu1 %v4604_v44  ;;  %v4670_v44 = vld [vmem:[%s6669_s9 + $0x4c8] ss:$36 sps:$4 sm:$0xff]  }
  0x25   :  { %2466 = vmatprep.subr.bf16.mxu1 %v4612_v46  ;;  %v4678_v46 = vld [vmem:[%s6669_s9 + $0x514] ss:$36 sps:$4 sm:$0xff]  }
  0x26   :  { %2586 = vmatpush1.bf16.msra.mxu0 %v4601_v45  ;;  %v4673_v45 = vld [vmem:[%s6669_s9 + $0x4d0] ss:$36 sps:$4 sm:$0xff]  }
  0x27   :  { %2587 = vmatprep.subr.bf16.mxu0 %v4609_v47  ;;  %v4681_v47 = vld [vmem:[%s6669_s9 + $0x51c] ss:$36 sps:$4 sm:$0xff]  }
  0x28   :  { %2467 = vmatpush1.bf16.msra.mxu1 %v4610_v48 }
  0x29   :  { %2468 = vmatprep.subr.bf16.mxu1 %v4618_v50 }
  0x2a   :  { %2588 = vmatpush1.bf16.msra.mxu0 %v4607_v49 }
  0x2b   :  { %2589 = vmatprep.subr.bf16.mxu0 %v4615_v51  ;;  %v4676_v51 = vld [vmem:[%s6669_s9 + $0x510] ss:$36 sps:$4 sm:$0xff]  }
  0x2c   :  { %2469 = vmatpush1.bf16.msra.mxu1 %v4616_v52  ;;  %v4679_v52 = vld [vmem:[%s6669_s9 + $0x518] ss:$36 sps:$4 sm:$0xff]  }
  0x2d   :  { %2470 = vmatprep.subr.bf16.mxu1 %v4624_v54  ;;  %v4687_v54 = vld [vmem:[%s6669_s9 + $0x564] ss:$36 sps:$4 sm:$0xff]  }
  0x2e   :  { %2590 = vmatpush1.bf16.msra.mxu0 %v4613_v53  ;;  %v4684_v53 = vld [vmem:[%s6669_s9 + $0x55c] ss:$36 sps:$4 sm:$0xff]  }
  0x2f   :  { %2591 = vmatprep.subr.bf16.mxu0 %v4621_v55  ;;  %v4682_v55 = vld [vmem:[%s6669_s9 + $0x558] ss:$36 sps:$4 sm:$0xff]  }
  0x30   :  { %2471 = vmatpush1.bf16.msra.mxu1 %v4622_v57  ;;  %v4690_v57 = vld [vmem:[%s6669_s9 + $0x5a4] ss:$36 sps:$4 sm:$0xff]  }
  0x31   :  { %2472 = vmatprep.subr.bf16.mxu1 %v4630_v59  ;;  %v4688_v59 = vld [vmem:[%s6669_s9 + $0x5a0] ss:$36 sps:$4 sm:$0xff]  }
  0x32   :  { %2592 = vmatpush1.bf16.msra.mxu0 %v4619_v56  ;;  %v4685_v56 = vld [vmem:[%s6669_s9 + $0x560] ss:$36 sps:$4 sm:$0xff]  }
  0x33   :  { %2593 = vmatprep.subr.bf16.mxu0 %v4627_v58  ;;  %v4693_v58 = vld [vmem:[%s6669_s9 + $0x5ac] ss:$36 sps:$4 sm:$0xff]  }
  0x34   :  { %2473 = vmatpush1.bf16.msra.mxu1 %v4628_v60  ;;  %v4691_v60 = vld [vmem:[%s6669_s9 + $0x5a8] ss:$36 sps:$4 sm:$0xff]  }
  0x35   :  { %2474 = vmatprep.subr.bf16.mxu1 %v4636_v62  ;;  %v4699_v62 = vld [vmem:[%s6669_s9 + $0x5f4] ss:$36 sps:$4 sm:$0xff]  }
  0x36   :  { %2594 = vmatpush1.bf16.msra.mxu0 %v4625_v61  ;;  %v4696_v61 = vld [vmem:[%s6669_s9 + $0x5ec] ss:$36 sps:$4 sm:$0xff]  }
  0x37   :  { %2595 = vmatprep.subr.bf16.mxu0 %v4633_v63  ;;  %v4694_v63 = vld [vmem:[%s6669_s9 + $0x5e8] ss:$36 sps:$4 sm:$0xff]  }
  0x38   :  { %2475 = vmatpush1.bf16.msra.mxu1 %v4634_v0  ;;  %v4697_v0 = vld [vmem:[%s6669_s9 + $0x5f0] ss:$36 sps:$4 sm:$0xff]  }
  0x39   :  { %2476 = vmatprep.subr.bf16.mxu1 %v4642_v2  ;;  %v4705_v2 = vld [vmem:[%s6669_s9 + $0x63c] ss:$36 sps:$4 sm:$0xff]  }
  0x3a   :  { %2596 = vmatpush1.bf16.msra.mxu0 %v4631_v1  ;;  %v4702_v1 = vld [vmem:[%s6669_s9 + $0x634] ss:$36 sps:$4 sm:$0xff]  }
  0x3b   :  { %2597 = vmatprep.subr.bf16.mxu0 %v4639_v4  ;;  %v4700_v4 = vld [vmem:[%s6669_s9 + $0x630] ss:$36 sps:$4 sm:$0xff]  }
  0x3c   :  { %2477 = vmatpush1.bf16.msra.mxu1 %v4640_v5  ;;  %v4703_v5 = vld [vmem:[%s6669_s9 + $0x638] ss:$36 sps:$4 sm:$0xff]  }
  0x3d   :  { %2478 = vmatprep.subr.bf16.mxu1 %v4648_v7  ;;  %v4711_v7 = vld [vmem:[%s6669_s9 + $0x684] ss:$36 sps:$4 sm:$0xff]  }
  0x3e   :  { %2598 = vmatpush1.bf16.msra.mxu0 %v4637_v6  ;;  %v4708_v6 = vld [vmem:[%s6669_s9 + $0x67c] ss:$36 sps:$4 sm:$0xff]  }
  0x3f   :  { %2599 = vmatprep.subr.bf16.mxu0 %v4645_v8  ;;  %v4706_v8 = vld [vmem:[%s6669_s9 + $0x678] ss:$36 sps:$4 sm:$0xff]  }
  0x40   :  { %2479 = vmatpush1.bf16.msra.mxu1 %v4646_v9  ;;  %v4709_v9 = vld [vmem:[%s6669_s9 + $0x680] ss:$36 sps:$4 sm:$0xff]  }
  0x41   :  { %2480 = vmatprep.subr.bf16.mxu1 %v4654_v11  ;;  %v4717_v11 = vld [vmem:[%s6669_s9 + $0x6cc] ss:$36 sps:$4 sm:$0xff]  }
  0x42   :  { %2600 = vmatpush1.bf16.msra.mxu0 %v4643_v10  ;;  %v4714_v10 = vld [vmem:[%s6669_s9 + $0x6c4] ss:$36 sps:$4 sm:$0xff]  }
  0x43   :  { %2601 = vmatprep.subr.bf16.mxu0 %v4651_v12  ;;  %v4712_v12 = vld [vmem:[%s6669_s9 + $0x6c0] ss:$36 sps:$4 sm:$0xff]  }
  0x44   :  { %2481 = vmatpush1.bf16.msra.mxu1 %v4652_v13  ;;  %v4715_v13 = vld [vmem:[%s6669_s9 + $0x6c8] ss:$36 sps:$4 sm:$0xff]  }
  0x45   :  { %2482 = vmatprep.subr.bf16.mxu1 %v4660_v18  ;;  %v4721_v18 = vld [vmem:[%s6669_s9 + $0x710] ss:$36 sps:$4 sm:$0xff]  }
  0x46   :  { %2602 = vmatpush1.bf16.msra.mxu0 %v4649_v14  ;;  %v4720_v14 = vld [vmem:[%s6669_s9 + $0x70c] ss:$36 sps:$4 sm:$0xff]  }
  0x47   :  { %2603 = vmatprep.subr.bf16.mxu0 %v4657_v15  ;;  %v4723_v15 = vld [vmem:[%s6669_s9 + $0x714] ss:$36 sps:$4 sm:$0xff]  }
  0x48   :  { %2483 = vmatpush1.bf16.msra.mxu1 %v4658_v20  ;;  %v4729_v20 = vld [vmem:[%s6669_s9 + $0x75c] ss:$36 sps:$4 sm:$0xff]  }
  0x49   :  { %2493 = vmatprep.subr.bf16.mxu1 %v4666_v22  ;;  %v4727_v22 = vld [vmem:[%s6669_s9 + $0x758] ss:$36 sps:$4 sm:$0xff]  }
  0x4a   :  { %2604 = vmatpush1.bf16.msra.mxu0 %v4655_v16  ;;  %v4718_v16 = vld [vmem:[%s6669_s9 + $0x708] ss:$36 sps:$4 sm:$0xff]  }
  0x4b   :  { %2605 = vmatprep.subr.bf16.mxu0 %v4663_v19  ;;  %v4726_v19 = vld [vmem:[%s6669_s9 + $0x754] ss:$36 sps:$4 sm:$0xff]  }
  0x4e   :  { %2606 = vmatpush1.bf16.msra.mxu0 %v4661_v21  ;;  %v4724_v21 = vld [vmem:[%s6669_s9 + $0x750] ss:$36 sps:$4 sm:$0xff]  }
  0x4f   :  { %2616 = vmatprep.subr.bf16.mxu0 %v4669_v23  ;;  %v4732_v23 = vld [vmem:[%s6669_s9 + $0x79c] ss:$36 sps:$4 sm:$0xff]  }
  0x86   :  { %v5487_v24 = vpop.permute.xlu0 %63 }
  0xdc   :  { %v114_v25 = vpop.f32.mrb[0].mxu0  ;;  %v5490_v27 = vpop.f32.mrb[0].mxu1 }
  0xdd   :  { %v115_v26 = vadd.f32 %v114_v25, %v5487_v24  ;;  %v116_v28 = vpop.f32.mrb[1].mxu0  ;;  %v159_v30 = vpop.f32.mrb[1].mxu1  ;;  %v4735_v25 = vld [vmem:[%s6669_s9 + $0x7a4] ss:$36 sps:$4 sm:$0xff]  }
  0xde   :  { %v117_v29 = vadd.f32 %v116_v28, %v5487_v24  ;;  %v5493_v31 = vpop.f32.mrb[2].mxu0  ;;  %v160_v32 = vadd.f32 %v159_v30, %v5487_v24  ;;  %v5498_v34 = vpop.f32.mrb[2].mxu1  ;;  %v4733_v28 = vld [vmem:[%s6669_s9 + $0x7a0] ss:$36 sps:$4 sm:$0xff]   ;;  %v4741_v30 = vld [vmem:[%s6669_s9 + $0x7ec] ss:$36 sps:$4 sm:$0xff]  }
  0xdf   :  { %v5496_v33 = vpop.f32.mrb[3].mxu0  ;;  %v5508_v38 = vpop.f32.mrb[3].mxu1  ;;  %v5510_v39 = vpack.c.bf16 %v115_v26, %v115_v26  ;;  %v4730_v26 = vld [vmem:[%s6669_s9 + $0x798] ss:$36 sps:$4 sm:$0xff]  }
  0xe0   :  { %v5500_v35 = vpack.c.bf16 %v117_v29, %v117_v29  ;;  %v5520_v42 = vpack.c.bf16 %v160_v32, %v160_v32  ;;  %v4738_v29 = vld [vmem:[%s6669_s9 + $0x7e4] ss:$36 sps:$4 sm:$0xff]  }
  0xe1   :  { %v4736_v32 = vld [vmem:[%s6669_s9 + $0x7e0] ss:$36 sps:$4 sm:$0xff]  }
  0xe2   :  { %2484 = vmatprep.mubr.bf16.mxu1 %v5500_v35  ;;  %2607 = vmatprep.mubr.bf16.mxu0 %v5500_v35 }
  0xe3   :  { %2485 = vmatmul.mubr.bf16.vlgmr.msra.gmra.mrb[4].mxu1 %v5510_v39  ;;  %2608 = vmatmul.mubr.bf16.vlgmr.msra.gmra.mrb[8].mxu0 %v5510_v39 }
  0xe4   :  { %2494 = vmatpush1.bf16.msra.mxu1 %v4664_v36  ;;  %2617 = vmatpush1.bf16.msra.mxu0 %v4667_v37  ;;  %v5524_v43 = vpop.f32.mrb[4].mxu0  ;;  %v4739_v36 = vld [vmem:[%s6669_s9 + $0x7e8] ss:$36 sps:$4 sm:$0xff]  }
  0xe5   :  { %2525 = vmatprep.mubr.bf16.mxu1 %v5520_v42  ;;  %2648 = vmatprep.mubr.bf16.mxu0 %v5520_v42  ;;  %v4447_v48 = vpop.f32.mrb[5].mxu0  ;;  %v4744_v37 = vld [vmem:[%s6669_s9 + $0x82c] ss:$36 sps:$4 sm:$0xff]  }
  0xe6   :  { %2495 = vmatprep.subr.bf16.mxu1 %v4672_v40  ;;  %2618 = vmatprep.subr.bf16.mxu0 %v4675_v41  ;;  %v5540_v49 = vpop.f32.mrb[6].mxu0  ;;  %v4747_v40 = vld [vmem:[%s6669_s9 + $0x834] ss:$36 sps:$4 sm:$0xff]   ;;  %v4742_v41 = vld [vmem:[%s6669_s9 + $0x828] ss:$36 sps:$4 sm:$0xff]  }
  0xe7   :  { %v4448_v50 = vpop.f32.mrb[7].mxu0  ;;  %v4751_v48 = vld [vmem:[%s6669_s9 + $0x878] ss:$36 sps:$4 sm:$0xff]  }
  0xe8   :  { %2496 = vmatpush1.bf16.msra.mxu1 %v4670_v44  ;;  %2619 = vmatpush1.bf16.msra.mxu0 %v4673_v45  ;;  %v4745_v44 = vld [vmem:[%s6669_s9 + $0x830] ss:$36 sps:$4 sm:$0xff]   ;;  %v4756_v50 = vld [vmem:[%s6669_s9 + $0x8bc] ss:$36 sps:$4 sm:$0xff]  }
  0xe9   :  { %2497 = vmatprep.subr.bf16.mxu1 %v4678_v46  ;;  %2620 = vmatprep.subr.bf16.mxu0 %v4681_v47  ;;  %v4750_v45 = vld [vmem:[%s6669_s9 + $0x874] ss:$36 sps:$4 sm:$0xff]   ;;  %v4753_v46 = vld [vmem:[%s6669_s9 + $0x87c] ss:$36 sps:$4 sm:$0xff]  }
  0xea   :  { %v4748_v47 = vld [vmem:[%s6669_s9 + $0x870] ss:$36 sps:$4 sm:$0xff]  }
  0xec   :  { %2498 = vmatpush1.bf16.msra.mxu1 %v4676_v51  ;;  %2621 = vmatpush1.bf16.msra.mxu0 %v4679_v52  ;;  %v4759_v51 = vld [vmem:[%s6669_s9 + $0x8c4] ss:$36 sps:$4 sm:$0xff]   ;;  %v4754_v52 = vld [vmem:[%s6669_s9 + $0x8b8] ss:$36 sps:$4 sm:$0xff]  }
  0xed   :  { %2499 = vmatprep.subr.bf16.mxu1 %v4684_v53  ;;  %2622 = vmatprep.subr.bf16.mxu0 %v4687_v54  ;;  %v4757_v53 = vld [vmem:[%s6669_s9 + $0x8c0] ss:$36 sps:$4 sm:$0xff]   ;;  %v158_v54 = vadd.f32 %v5490_v27, %v5487_v24  ;;  %v4763_v27 = vld [vmem:[%s6669_s9 + $0x908] ss:$36 sps:$4 sm:$0xff]  }
  0xf0   :  { %2500 = vmatpush1.bf16.msra.mxu1 %v4682_v55  ;;  %2623 = vmatpush1.bf16.msra.mxu0 %v4685_v56  ;;  %v4762_v55 = vld [vmem:[%s6669_s9 + $0x904] ss:$36 sps:$4 sm:$0xff]   ;;  %v4765_v56 = vld [vmem:[%s6669_s9 + $0x90c] ss:$36 sps:$4 sm:$0xff]  }
  0xf1   :  { %2501 = vmatprep.subr.bf16.mxu1 %v4690_v57  ;;  %2624 = vmatprep.subr.bf16.mxu0 %v4693_v58  ;;  %v4760_v57 = vld [vmem:[%s6669_s9 + $0x900] ss:$36 sps:$4 sm:$0xff]   ;;  %v5718_v58 = vpack.c.bf16 %v158_v54, %v158_v54  ;;  %v4832_v54 = vld [vmem:[%s6669_s9 + $0x130] ss:$36 sps:$4 sm:$0xff]  }
  0xf4   :  { %2502 = vmatpush1.bf16.msra.mxu1 %v4688_v59  ;;  %2625 = vmatpush1.bf16.msra.mxu0 %v4691_v60  ;;  %v4768_v59 = vld [vmem:[%s6669_s9 + $0x94c] ss:$36 sps:$4 sm:$0xff]   ;;  %v4771_v60 = vld [vmem:[%s6669_s9 + $0x954] ss:$36 sps:$4 sm:$0xff]  }
  0xf5   :  { %2503 = vmatprep.subr.bf16.mxu1 %v4696_v61  ;;  %2626 = vmatprep.subr.bf16.mxu0 %v4699_v62  ;;  %v4766_v61 = vld [vmem:[%s6669_s9 + $0x948] ss:$36 sps:$4 sm:$0xff]   ;;  %v4769_v62 = vld [vmem:[%s6669_s9 + $0x950] ss:$36 sps:$4 sm:$0xff]  }
  0xf8   :  { %2504 = vmatpush1.bf16.msra.mxu1 %v4694_v63  ;;  %2627 = vmatpush1.bf16.msra.mxu0 %v4697_v0  ;;  %v4774_v63 = vld [vmem:[%s6669_s9 + $0x994] ss:$36 sps:$4 sm:$0xff]   ;;  %v4777_v0 = vld [vmem:[%s6669_s9 + $0x99c] ss:$36 sps:$4 sm:$0xff]  }
  0xf9   :  { %2505 = vmatprep.subr.bf16.mxu1 %v4702_v1  ;;  %2628 = vmatprep.subr.bf16.mxu0 %v4705_v2  ;;  %v4772_v1 = vld [vmem:[%s6669_s9 + $0x990] ss:$36 sps:$4 sm:$0xff]   ;;  %v4775_v2 = vld [vmem:[%s6669_s9 + $0x998] ss:$36 sps:$4 sm:$0xff]  }
  0xfc   :  { %2506 = vmatpush1.bf16.msra.mxu1 %v4700_v4  ;;  %2629 = vmatpush1.bf16.msra.mxu0 %v4703_v5  ;;  %v4780_v4 = vld [vmem:[%s6669_s9 + $0x9dc] ss:$36 sps:$4 sm:$0xff]   ;;  %v4783_v5 = vld [vmem:[%s6669_s9 + $0x9e4] ss:$36 sps:$4 sm:$0xff]  }
  0xfd   :  { %2507 = vmatprep.subr.bf16.mxu1 %v4708_v6  ;;  %2630 = vmatprep.subr.bf16.mxu0 %v4711_v7  ;;  %v4778_v6 = vld [vmem:[%s6669_s9 + $0x9d8] ss:$36 sps:$4 sm:$0xff]   ;;  %v4781_v7 = vld [vmem:[%s6669_s9 + $0x9e0] ss:$36 sps:$4 sm:$0xff]  }
 0x100   :  { %2508 = vmatpush1.bf16.msra.mxu1 %v4706_v8  ;;  %2631 = vmatpush1.bf16.msra.mxu0 %v4709_v9  ;;  %v4786_v8 = vld [vmem:[%s6669_s9 + $0xa24] ss:$36 sps:$4 sm:$0xff]   ;;  %v4789_v9 = vld [vmem:[%s6669_s9 + $0xa2c] ss:$36 sps:$4 sm:$0xff]  }
 0x101   :  { %2509 = vmatprep.subr.bf16.mxu1 %v4714_v10  ;;  %2632 = vmatprep.subr.bf16.mxu0 %v4717_v11  ;;  %v4784_v10 = vld [vmem:[%s6669_s9 + $0xa20] ss:$36 sps:$4 sm:$0xff]   ;;  %v4787_v11 = vld [vmem:[%s6669_s9 + $0xa28] ss:$36 sps:$4 sm:$0xff]  }
 0x104   :  { %2510 = vmatpush1.bf16.msra.mxu1 %v4712_v12  ;;  %2633 = vmatpush1.bf16.msra.mxu0 %v4715_v13  ;;  %v4792_v12 = vld [vmem:[%s6669_s9 + $0xa6c] ss:$36 sps:$4 sm:$0xff]   ;;  %v4795_v13 = vld [vmem:[%s6669_s9 + $0xa74] ss:$36 sps:$4 sm:$0xff]  }
 0x105   :  { %2511 = vmatprep.subr.bf16.mxu1 %v4720_v14  ;;  %2634 = vmatprep.subr.bf16.mxu0 %v4723_v15  ;;  %v4790_v14 = vld [vmem:[%s6669_s9 + $0xa68] ss:$36 sps:$4 sm:$0xff]   ;;  %v4793_v15 = vld [vmem:[%s6669_s9 + $0xa70] ss:$36 sps:$4 sm:$0xff]  }
 0x108   :  { %2512 = vmatpush1.bf16.msra.mxu1 %v4718_v16  ;;  %2635 = vmatpush1.bf16.msra.mxu0 %v4721_v18  ;;  %v4798_v16 = vld [vmem:[%s6669_s9 + $0xab4] ss:$36 sps:$4 sm:$0xff]   ;;  %v4801_v18 = vld [vmem:[%s6669_s9 + $0xabc] ss:$36 sps:$4 sm:$0xff]  }
 0x109   :  { %2513 = vmatprep.subr.bf16.mxu1 %v4726_v19  ;;  %2636 = vmatprep.subr.bf16.mxu0 %v4729_v20  ;;  %v4796_v19 = vld [vmem:[%s6669_s9 + $0xab0] ss:$36 sps:$4 sm:$0xff]   ;;  %v4799_v20 = vld [vmem:[%s6669_s9 + $0xab8] ss:$36 sps:$4 sm:$0xff]  }
 0x10c   :  { %2514 = vmatpush1.bf16.msra.mxu1 %v4724_v21  ;;  %2637 = vmatpush1.bf16.msra.mxu0 %v4727_v22  ;;  %v4804_v21 = vld [vmem:[%s6669_s9 + $0xafc] ss:$36 sps:$4 sm:$0xff]   ;;  %v4807_v22 = vld [vmem:[%s6669_s9 + $0xb04] ss:$36 sps:$4 sm:$0xff]  }
 0x10d   :  { %2515 = vmatprep.subr.bf16.mxu1 %v4732_v23  ;;  %2638 = vmatprep.subr.bf16.mxu0 %v4735_v25  ;;  %v4802_v23 = vld [vmem:[%s6669_s9 + $0xaf8] ss:$36 sps:$4 sm:$0xff]   ;;  %v4805_v25 = vld [vmem:[%s6669_s9 + $0xb00] ss:$36 sps:$4 sm:$0xff]  }
 0x110   :  { %2516 = vmatpush1.bf16.msra.mxu1 %v4730_v26  ;;  %2639 = vmatpush1.bf16.msra.mxu0 %v4733_v28  ;;  %v201_v26 = vadd.f32 %v5524_v43, %v5487_v24  ;;  %v4810_v28 = vld [vmem:[%s6669_s9 + $0x14] ss:$36 sps:$4 sm:$0xff]   ;;  %v4816_v43 = vld [vmem:[%s6669_s9 + $0x5c] ss:$36 sps:$4 sm:$0xff]  }
 0x111   :  { %2517 = vmatprep.subr.bf16.mxu1 %v4738_v29  ;;  %2640 = vmatprep.subr.bf16.mxu0 %v4741_v30  ;;  %v4813_v29 = vld [vmem:[%s6669_s9 + $0x1c] ss:$36 sps:$4 sm:$0xff]   ;;  %v4808_v30 = vld [vmem:[%s6669_s9 + $0x10] ss:$36 sps:$4 sm:$0xff]  }
 0x112   :  { %v4811_v24 = vld [vmem:[%s6669_s9 + $0x18] ss:$36 sps:$4 sm:$0xff]  }
 0x114   :  { %2518 = vmatpush1.bf16.msra.mxu1 %v4736_v32  ;;  %2641 = vmatpush1.bf16.msra.mxu0 %v4739_v36  ;;  %v5819_v32 = vpack.c.bf16 %v201_v26, %v201_v26  ;;  %v4819_v36 = vld [vmem:[%s6669_s9 + $0x64] ss:$36 sps:$4 sm:$0xff]   ;;  %v4883_v26 = vld [vmem:[%s6669_s9 + $0x378] ss:$36 sps:$4 sm:$0xff]  }
 0x115   :  { %2519 = vmatprep.subr.bf16.mxu1 %v4744_v37  ;;  %2642 = vmatprep.subr.bf16.mxu0 %v4747_v40  ;;  %v4814_v37 = vld [vmem:[%s6669_s9 + $0x58] ss:$36 sps:$4 sm:$0xff]   ;;  %v4817_v40 = vld [vmem:[%s6669_s9 + $0x60] ss:$36 sps:$4 sm:$0xff]  }
 0x118   :  { %2520 = vmatpush1.bf16.msra.mxu1 %v4742_v41  ;;  %2643 = vmatpush1.bf16.msra.mxu0 %v4745_v44  ;;  %v4822_v41 = vld [vmem:[%s6669_s9 + $0xa4] ss:$36 sps:$4 sm:$0xff]   ;;  %v4825_v44 = vld [vmem:[%s6669_s9 + $0xac] ss:$36 sps:$4 sm:$0xff]  }
 0x119   :  { %2521 = vmatprep.subr.bf16.mxu1 %v4750_v45  ;;  %2644 = vmatprep.subr.bf16.mxu0 %v4753_v46  ;;  %v4820_v45 = vld [vmem:[%s6669_s9 + $0xa0] ss:$36 sps:$4 sm:$0xff]   ;;  %v4823_v46 = vld [vmem:[%s6669_s9 + $0xa8] ss:$36 sps:$4 sm:$0xff]  }
 0x11c   :  { %2522 = vmatpush1.bf16.msra.mxu1 %v4748_v47  ;;  %2645 = vmatpush1.bf16.msra.mxu0 %v4751_v48  ;;  %v4828_v47 = vld [vmem:[%s6669_s9 + $0xec] ss:$36 sps:$4 sm:$0xff]   ;;  %v4831_v48 = vld [vmem:[%s6669_s9 + $0xf4] ss:$36 sps:$4 sm:$0xff]  }
 0x11d   :  { %2523 = vmatprep.subr.bf16.mxu1 %v4756_v50  ;;  %2646 = vmatprep.subr.bf16.mxu0 %v4759_v51  ;;  %v4826_v50 = vld [vmem:[%s6669_s9 + $0xe8] ss:$36 sps:$4 sm:$0xff]   ;;  %v4829_v51 = vld [vmem:[%s6669_s9 + $0xf0] ss:$36 sps:$4 sm:$0xff]  }
 0x120   :  { %2524 = vmatpush1.bf16.msra.mxu1 %v4754_v52  ;;  %2647 = vmatpush1.bf16.msra.mxu0 %v4757_v53  ;;  %v4834_v52 = vld [vmem:[%s6669_s9 + $0x134] ss:$36 sps:$4 sm:$0xff]   ;;  %v4837_v53 = vld [vmem:[%s6669_s9 + $0x13c] ss:$36 sps:$4 sm:$0xff]  }
 0x121   :  { %2534 = vmatprep.subr.bf16.mxu1 %v4762_v55  ;;  %2657 = vmatprep.subr.bf16.mxu0 %v4765_v56  ;;  %v4835_v55 = vld [vmem:[%s6669_s9 + $0x138] ss:$36 sps:$4 sm:$0xff]  }
 0x122   :  { %v4840_v56 = vld [vmem:[%s6669_s9 + $0x17c] ss:$36 sps:$4 sm:$0xff]  }
 0x123   :  { %2526 = vmatmul.mubr.bf16.vlgmr.msra.gmra.mrb[4].mxu1 %v5718_v58  ;;  %2649 = vmatmul.mubr.bf16.vlgmr.msra.gmra.mrb[8].mxu0 %v5718_v58 }
 0x124   :  { %2535 = vmatpush1.bf16.msra.mxu1 %v4760_v57  ;;  %2658 = vmatpush1.bf16.msra.mxu0 %v4763_v27  ;;  %v4843_v57 = vld [vmem:[%s6669_s9 + $0x184] ss:$36 sps:$4 sm:$0xff]   ;;  %v4838_v27 = vld [vmem:[%s6669_s9 + $0x178] ss:$36 sps:$4 sm:$0xff]  }
 0x125   :  { %2536 = vmatprep.subr.bf16.mxu1 %v4768_v59  ;;  %2659 = vmatprep.subr.bf16.mxu0 %v4771_v60  ;;  %v4841_v59 = vld [vmem:[%s6669_s9 + $0x180] ss:$36 sps:$4 sm:$0xff]  }
 0x126   :  { %2566 = vmatprep.mubr.bf16.mxu1 %v5163_v3  ;;  %2689 = vmatprep.mubr.bf16.mxu0 %v5163_v3  ;;  %v4846_v60 = vld [vmem:[%s6669_s9 + $0x1c4] ss:$36 sps:$4 sm:$0xff]  }
 0x128   :  { %2537 = vmatpush1.bf16.msra.mxu1 %v4766_v61  ;;  %2660 = vmatpush1.bf16.msra.mxu0 %v4769_v62  ;;  %v4849_v61 = vld [vmem:[%s6669_s9 + $0x1cc] ss:$36 sps:$4 sm:$0xff]   ;;  %v4844_v62 = vld [vmem:[%s6669_s9 + $0x1c0] ss:$36 sps:$4 sm:$0xff]  }
 0x129   :  { %2538 = vmatprep.subr.bf16.mxu1 %v4774_v63  ;;  %2661 = vmatprep.subr.bf16.mxu0 %v4777_v0  ;;  %v4847_v63 = vld [vmem:[%s6669_s9 + $0x1c8] ss:$36 sps:$4 sm:$0xff]  }
 0x12a   :  { %v4852_v0 = vld [vmem:[%s6669_s9 + $0x20c] ss:$36 sps:$4 sm:$0xff]  }
 0x12c   :  { %2539 = vmatpush1.bf16.msra.mxu1 %v4772_v1  ;;  %2662 = vmatpush1.bf16.msra.mxu0 %v4775_v2  ;;  %v4855_v1 = vld [vmem:[%s6669_s9 + $0x214] ss:$36 sps:$4 sm:$0xff]   ;;  %v4850_v2 = vld [vmem:[%s6669_s9 + $0x208] ss:$36 sps:$4 sm:$0xff]  }
 0x12d   :  { %2540 = vmatprep.subr.bf16.mxu1 %v4780_v4  ;;  %2663 = vmatprep.subr.bf16.mxu0 %v4783_v5  ;;  %v4853_v4 = vld [vmem:[%s6669_s9 + $0x210] ss:$36 sps:$4 sm:$0xff]  }
 0x12e   :  { %v4858_v5 = vld [vmem:[%s6669_s9 + $0x254] ss:$36 sps:$4 sm:$0xff]  }
 0x130   :  { %2541 = vmatpush1.bf16.msra.mxu1 %v4778_v6  ;;  %2664 = vmatpush1.bf16.msra.mxu0 %v4781_v7  ;;  %v4861_v6 = vld [vmem:[%s6669_s9 + $0x25c] ss:$36 sps:$4 sm:$0xff]   ;;  %v4856_v7 = vld [vmem:[%s6669_s9 + $0x250] ss:$36 sps:$4 sm:$0xff]  }
 0x131   :  { %2542 = vmatprep.subr.bf16.mxu1 %v4786_v8  ;;  %2665 = vmatprep.subr.bf16.mxu0 %v4789_v9  ;;  %v4859_v8 = vld [vmem:[%s6669_s9 + $0x258] ss:$36 sps:$4 sm:$0xff]  }
 0x132   :  { %v4864_v9 = vld [vmem:[%s6669_s9 + $0x29c] ss:$36 sps:$4 sm:$0xff]  }
 0x134   :  { %2543 = vmatpush1.bf16.msra.mxu1 %v4784_v10  ;;  %2666 = vmatpush1.bf16.msra.mxu0 %v4787_v11  ;;  %v4867_v10 = vld [vmem:[%s6669_s9 + $0x2a4] ss:$36 sps:$4 sm:$0xff]   ;;  %v4862_v11 = vld [vmem:[%s6669_s9 + $0x298] ss:$36 sps:$4 sm:$0xff]  }
 0x135   :  { %2544 = vmatprep.subr.bf16.mxu1 %v4792_v12  ;;  %2667 = vmatprep.subr.bf16.mxu0 %v4795_v13  ;;  %v4865_v12 = vld [vmem:[%s6669_s9 + $0x2a0] ss:$36 sps:$4 sm:$0xff]  }
 0x136   :  { %v4870_v13 = vld [vmem:[%s6669_s9 + $0x2e4] ss:$36 sps:$4 sm:$0xff]  }
 0x138   :  { %2545 = vmatpush1.bf16.msra.mxu1 %v4790_v14  ;;  %2668 = vmatpush1.bf16.msra.mxu0 %v4793_v15  ;;  %v4873_v14 = vld [vmem:[%s6669_s9 + $0x2ec] ss:$36 sps:$4 sm:$0xff]   ;;  %v4868_v15 = vld [vmem:[%s6669_s9 + $0x2e0] ss:$36 sps:$4 sm:$0xff]  }
 0x139   :  { %2546 = vmatprep.subr.bf16.mxu1 %v4798_v16  ;;  %2669 = vmatprep.subr.bf16.mxu0 %v4801_v18  ;;  %v4871_v16 = vld [vmem:[%s6669_s9 + $0x2e8] ss:$36 sps:$4 sm:$0xff]  }
 0x13a   :  { %v4876_v18 = vld [vmem:[%s6669_s9 + $0x32c] ss:$36 sps:$4 sm:$0xff]  }
 0x13c   :  { %2547 = vmatpush1.bf16.msra.mxu1 %v4796_v19  ;;  %2670 = vmatpush1.bf16.msra.mxu0 %v4799_v20  ;;  %v4879_v19 = vld [vmem:[%s6669_s9 + $0x334] ss:$36 sps:$4 sm:$0xff]   ;;  %v4874_v20 = vld [vmem:[%s6669_s9 + $0x328] ss:$36 sps:$4 sm:$0xff]  }
 0x13d   :  { %2548 = vmatprep.subr.bf16.mxu1 %v4804_v21  ;;  %2671 = vmatprep.subr.bf16.mxu0 %v4807_v22  ;;  %v4877_v21 = vld [vmem:[%s6669_s9 + $0x330] ss:$36 sps:$4 sm:$0xff]  }
 0x13e   :  { %v4882_v22 = vld [vmem:[%s6669_s9 + $0x374] ss:$36 sps:$4 sm:$0xff]  }
 0x140   :  { %2549 = vmatpush1.bf16.msra.mxu1 %v4802_v23  ;;  %2672 = vmatpush1.bf16.msra.mxu0 %v4805_v25  ;;  %v4885_v23 = vld [vmem:[%s6669_s9 + $0x37c] ss:$36 sps:$4 sm:$0xff]   ;;  %v4880_v25 = vld [vmem:[%s6669_s9 + $0x370] ss:$36 sps:$4 sm:$0xff]  }
 0x141   :  { %2698 = vmatprep.subr.bf16.mxu1 %v4810_v28  ;;  %2821 = vmatprep.subr.bf16.mxu0 %v4813_v29  ;;  %v4888_v28 = vld [vmem:[%s6669_s9 + $0x3bc] ss:$36 sps:$4 sm:$0xff]   ;;  %v4891_v29 = vld [vmem:[%s6669_s9 + $0x3c4] ss:$36 sps:$4 sm:$0xff]  }
 0x143   :  { %2567 = vmatmul.mubr.bf16.vlgmr.msra.gmra.mrb[4].mxu1 %v5819_v32  ;;  %2690 = vmatmul.mubr.bf16.vlgmr.msra.gmra.mrb[8].mxu0 %v5819_v32 }
 0x144   :  { %2699 = vmatpush1.bf16.msra.mxu1 %v4808_v30  ;;  %2730 = vmatprep.mubr.bf16.mxu1 %v5500_v35  ;;  %v4886_v30 = vld [vmem:[%s6669_s9 + $0x3b8] ss:$36 sps:$4 sm:$0xff]  }
 0x145   :  { %2822 = vmatpush1.bf16.msra.mxu0 %v4811_v24  ;;  %2853 = vmatprep.mubr.bf16.mxu0 %v5500_v35  ;;  %v4889_v24 = vld [vmem:[%s6669_s9 + $0x3c0] ss:$36 sps:$4 sm:$0xff]  }
 0x146   :  { %2700 = vmatprep.subr.bf16.mxu1 %v4816_v43  ;;  %2823 = vmatprep.subr.bf16.mxu0 %v4819_v36  ;;  %v4894_v43 = vld [vmem:[%s6669_s9 + $0x404] ss:$36 sps:$4 sm:$0xff]   ;;  %v4897_v36 = vld [vmem:[%s6669_s9 + $0x40c] ss:$36 sps:$4 sm:$0xff]  }
 0x148   :  { %2701 = vmatpush1.bf16.msra.mxu1 %v4814_v37  ;;  %v4892_v37 = vld [vmem:[%s6669_s9 + $0x400] ss:$36 sps:$4 sm:$0xff]  }
 0x149   :  { %2824 = vmatpush1.bf16.msra.mxu0 %v4817_v40  ;;  %2702 = vmatprep.subr.bf16.mxu1 %v4822_v41  ;;  %v4895_v40 = vld [vmem:[%s6669_s9 + $0x408] ss:$36 sps:$4 sm:$0xff]  }
 0x14a   :  { %2825 = vmatprep.subr.bf16.mxu0 %v4825_v44  ;;  %v4900_v41 = vld [vmem:[%s6669_s9 + $0x44c] ss:$36 sps:$4 sm:$0xff]   ;;  %v4903_v44 = vld [vmem:[%s6669_s9 + $0x454] ss:$36 sps:$4 sm:$0xff]  }
 0x14c   :  { %2703 = vmatpush1.bf16.msra.mxu1 %v4820_v45  ;;  %v4898_v45 = vld [vmem:[%s6669_s9 + $0x448] ss:$36 sps:$4 sm:$0xff]  }
 0x14d   :  { %2826 = vmatpush1.bf16.msra.mxu0 %v4823_v46  ;;  %2704 = vmatprep.subr.bf16.mxu1 %v4828_v47  ;;  %v4901_v46 = vld [vmem:[%s6669_s9 + $0x450] ss:$36 sps:$4 sm:$0xff]  }
 0x14e   :  { %2827 = vmatprep.subr.bf16.mxu0 %v4831_v48  ;;  %v4906_v47 = vld [vmem:[%s6669_s9 + $0x494] ss:$36 sps:$4 sm:$0xff]   ;;  %v4909_v48 = vld [vmem:[%s6669_s9 + $0x49c] ss:$36 sps:$4 sm:$0xff]  }
 0x150   :  { %2705 = vmatpush1.bf16.msra.mxu1 %v4826_v50  ;;  %v4904_v50 = vld [vmem:[%s6669_s9 + $0x490] ss:$36 sps:$4 sm:$0xff]  }
 0x151   :  { %2828 = vmatpush1.bf16.msra.mxu0 %v4829_v51  ;;  %2706 = vmatprep.subr.bf16.mxu1 %v4834_v52  ;;  %v4907_v51 = vld [vmem:[%s6669_s9 + $0x498] ss:$36 sps:$4 sm:$0xff]  }
 0x152   :  { %2829 = vmatprep.subr.bf16.mxu0 %v4837_v53  ;;  %v4912_v52 = vld [vmem:[%s6669_s9 + $0x4dc] ss:$36 sps:$4 sm:$0xff]   ;;  %v4915_v53 = vld [vmem:[%s6669_s9 + $0x4e4] ss:$36 sps:$4 sm:$0xff]  }
 0x154   :  { %2707 = vmatpush1.bf16.msra.mxu1 %v4832_v54  ;;  %v4910_v54 = vld [vmem:[%s6669_s9 + $0x4d8] ss:$36 sps:$4 sm:$0xff]  }
 0x155   :  { %2830 = vmatpush1.bf16.msra.mxu0 %v4835_v55  ;;  %2708 = vmatprep.subr.bf16.mxu1 %v4840_v56  ;;  %v4913_v55 = vld [vmem:[%s6669_s9 + $0x4e0] ss:$36 sps:$4 sm:$0xff]  }
 0x156   :  { %2831 = vmatprep.subr.bf16.mxu0 %v4843_v57  ;;  %v4918_v56 = vld [vmem:[%s6669_s9 + $0x524] ss:$36 sps:$4 sm:$0xff]   ;;  %v4921_v57 = vld [vmem:[%s6669_s9 + $0x52c] ss:$36 sps:$4 sm:$0xff]  }
 0x158   :  { %2709 = vmatpush1.bf16.msra.mxu1 %v4838_v27  ;;  %v4916_v27 = vld [vmem:[%s6669_s9 + $0x520] ss:$36 sps:$4 sm:$0xff]  }
 0x159   :  { %2832 = vmatpush1.bf16.msra.mxu0 %v4841_v59  ;;  %2710 = vmatprep.subr.bf16.mxu1 %v4846_v60  ;;  %v4919_v59 = vld [vmem:[%s6669_s9 + $0x528] ss:$36 sps:$4 sm:$0xff]  }
 0x15a   :  { %2833 = vmatprep.subr.bf16.mxu0 %v4849_v61  ;;  %v4924_v60 = vld [vmem:[%s6669_s9 + $0x56c] ss:$36 sps:$4 sm:$0xff]   ;;  %v4927_v61 = vld [vmem:[%s6669_s9 + $0x574] ss:$36 sps:$4 sm:$0xff]  }
 0x15c   :  { %2711 = vmatpush1.bf16.msra.mxu1 %v4844_v62  ;;  %v4922_v62 = vld [vmem:[%s6669_s9 + $0x568] ss:$36 sps:$4 sm:$0xff]  }
 0x15d   :  { %2834 = vmatpush1.bf16.msra.mxu0 %v4847_v63  ;;  %2712 = vmatprep.subr.bf16.mxu1 %v4852_v0  ;;  %v4925_v63 = vld [vmem:[%s6669_s9 + $0x570] ss:$36 sps:$4 sm:$0xff]  }
 0x15e   :  { %2835 = vmatprep.subr.bf16.mxu0 %v4855_v1  ;;  %v4930_v0 = vld [vmem:[%s6669_s9 + $0x5b4] ss:$36 sps:$4 sm:$0xff]   ;;  %v4933_v1 = vld [vmem:[%s6669_s9 + $0x5bc] ss:$36 sps:$4 sm:$0xff]  }
 0x160   :  { %2713 = vmatpush1.bf16.msra.mxu1 %v4850_v2  ;;  %v4928_v2 = vld [vmem:[%s6669_s9 + $0x5b0] ss:$36 sps:$4 sm:$0xff]  }
 0x161   :  { %2836 = vmatpush1.bf16.msra.mxu0 %v4853_v4  ;;  %2714 = vmatprep.subr.bf16.mxu1 %v4858_v5  ;;  %v4931_v4 = vld [vmem:[%s6669_s9 + $0x5b8] ss:$36 sps:$4 sm:$0xff]  }
 0x162   :  { %2837 = vmatprep.subr.bf16.mxu0 %v4861_v6  ;;  %v4936_v5 = vld [vmem:[%s6669_s9 + $0x5fc] ss:$36 sps:$4 sm:$0xff]   ;;  %v4939_v6 = vld [vmem:[%s6669_s9 + $0x604] ss:$36 sps:$4 sm:$0xff]  }
 0x164   :  { %2715 = vmatpush1.bf16.msra.mxu1 %v4856_v7  ;;  %v4934_v7 = vld [vmem:[%s6669_s9 + $0x5f8] ss:$36 sps:$4 sm:$0xff]  }
 0x165   :  { %2838 = vmatpush1.bf16.msra.mxu0 %v4859_v8  ;;  %2716 = vmatprep.subr.bf16.mxu1 %v4864_v9  ;;  %v4937_v8 = vld [vmem:[%s6669_s9 + $0x600] ss:$36 sps:$4 sm:$0xff]  }
 0x166   :  { %2839 = vmatprep.subr.bf16.mxu0 %v4867_v10  ;;  %v4942_v9 = vld [vmem:[%s6669_s9 + $0x644] ss:$36 sps:$4 sm:$0xff]   ;;  %v4945_v10 = vld [vmem:[%s6669_s9 + $0x64c] ss:$36 sps:$4 sm:$0xff]  }
 0x168   :  { %2717 = vmatpush1.bf16.msra.mxu1 %v4862_v11  ;;  %v4940_v11 = vld [vmem:[%s6669_s9 + $0x640] ss:$36 sps:$4 sm:$0xff]  }
 0x169   :  { %2840 = vmatpush1.bf16.msra.mxu0 %v4865_v12  ;;  %2718 = vmatprep.subr.bf16.mxu1 %v4870_v13  ;;  %v4943_v12 = vld [vmem:[%s6669_s9 + $0x648] ss:$36 sps:$4 sm:$0xff]  }
 0x16a   :  { %2841 = vmatprep.subr.bf16.mxu0 %v4873_v14  ;;  %v4948_v13 = vld [vmem:[%s6669_s9 + $0x68c] ss:$36 sps:$4 sm:$0xff]   ;;  %v4951_v14 = vld [vmem:[%s6669_s9 + $0x694] ss:$36 sps:$4 sm:$0xff]  }
 0x16c   :  { %2719 = vmatpush1.bf16.msra.mxu1 %v4868_v15  ;;  %v4946_v15 = vld [vmem:[%s6669_s9 + $0x688] ss:$36 sps:$4 sm:$0xff]  }
 0x16d   :  { %2842 = vmatpush1.bf16.msra.mxu0 %v4871_v16  ;;  %2720 = vmatprep.subr.bf16.mxu1 %v4876_v18  ;;  %v4949_v16 = vld [vmem:[%s6669_s9 + $0x690] ss:$36 sps:$4 sm:$0xff]  }
 0x16e   :  { %2843 = vmatprep.subr.bf16.mxu0 %v4879_v19  ;;  %v4954_v18 = vld [vmem:[%s6669_s9 + $0x6d4] ss:$36 sps:$4 sm:$0xff]   ;;  %v4957_v19 = vld [vmem:[%s6669_s9 + $0x6dc] ss:$36 sps:$4 sm:$0xff]  }
 0x170   :  { %2721 = vmatpush1.bf16.msra.mxu1 %v4874_v20  ;;  %v4952_v20 = vld [vmem:[%s6669_s9 + $0x6d0] ss:$36 sps:$4 sm:$0xff]  }
 0x171   :  { %2844 = vmatpush1.bf16.msra.mxu0 %v4877_v21  ;;  %2722 = vmatprep.subr.bf16.mxu1 %v4882_v22  ;;  %v4955_v21 = vld [vmem:[%s6669_s9 + $0x6d8] ss:$36 sps:$4 sm:$0xff]  }
 0x172   :  { %2845 = vmatprep.subr.bf16.mxu0 %v4885_v23  ;;  %v4960_v22 = vld [vmem:[%s6669_s9 + $0x71c] ss:$36 sps:$4 sm:$0xff]   ;;  %v4963_v23 = vld [vmem:[%s6669_s9 + $0x724] ss:$36 sps:$4 sm:$0xff]  }
 0x174   :  { %2723 = vmatpush1.bf16.msra.mxu1 %v4880_v25  ;;  %v4958_v25 = vld [vmem:[%s6669_s9 + $0x718] ss:$36 sps:$4 sm:$0xff]  }
 0x175   :  { %2846 = vmatpush1.bf16.msra.mxu0 %v4883_v26  ;;  %2724 = vmatprep.subr.bf16.mxu1 %v4888_v28  ;;  %v4961_v26 = vld [vmem:[%s6669_s9 + $0x720] ss:$36 sps:$4 sm:$0xff]  }
 0x176   :  { %2847 = vmatprep.subr.bf16.mxu0 %v4891_v29  ;;  %v4966_v28 = vld [vmem:[%s6669_s9 + $0x764] ss:$36 sps:$4 sm:$0xff]   ;;  %v4969_v29 = vld [vmem:[%s6669_s9 + $0x76c] ss:$36 sps:$4 sm:$0xff]  }
 0x178   :  { %2725 = vmatpush1.bf16.msra.mxu1 %v4886_v30  ;;  %v4964_v30 = vld [vmem:[%s6669_s9 + $0x760] ss:$36 sps:$4 sm:$0xff]  }
 0x179   :  { %2848 = vmatpush1.bf16.msra.mxu0 %v4889_v24  ;;  %2726 = vmatprep.subr.bf16.mxu1 %v4894_v43  ;;  %v4967_v24 = vld [vmem:[%s6669_s9 + $0x768] ss:$36 sps:$4 sm:$0xff]  }
 0x17a   :  { %2849 = vmatprep.subr.bf16.mxu0 %v4897_v36  ;;  %v4972_v43 = vld [vmem:[%s6669_s9 + $0x7ac] ss:$36 sps:$4 sm:$0xff]   ;;  %v4975_v36 = vld [vmem:[%s6669_s9 + $0x7b4] ss:$36 sps:$4 sm:$0xff]  }
 0x17c   :  { %2727 = vmatpush1.bf16.msra.mxu1 %v4892_v37  ;;  %v4970_v37 = vld [vmem:[%s6669_s9 + $0x7a8] ss:$36 sps:$4 sm:$0xff]  }
 0x17d   :  { %2850 = vmatpush1.bf16.msra.mxu0 %v4895_v40  ;;  %2728 = vmatprep.subr.bf16.mxu1 %v4900_v41  ;;  %v4973_v40 = vld [vmem:[%s6669_s9 + $0x7b0] ss:$36 sps:$4 sm:$0xff]  }
 0x17e   :  { %2851 = vmatprep.subr.bf16.mxu0 %v4903_v44  ;;  %v4978_v41 = vld [vmem:[%s6669_s9 + $0x7f4] ss:$36 sps:$4 sm:$0xff]   ;;  %v4981_v44 = vld [vmem:[%s6669_s9 + $0x7fc] ss:$36 sps:$4 sm:$0xff]  }
 0x180   :  { %2729 = vmatpush1.bf16.msra.mxu1 %v4898_v45  ;;  %v4976_v45 = vld [vmem:[%s6669_s9 + $0x7f0] ss:$36 sps:$4 sm:$0xff]  }
 0x181   :  { %2852 = vmatpush1.bf16.msra.mxu0 %v4901_v46  ;;  %2739 = vmatprep.subr.bf16.mxu1 %v4906_v47  ;;  %v4979_v46 = vld [vmem:[%s6669_s9 + $0x7f8] ss:$36 sps:$4 sm:$0xff]  }
 0x182   :  { %2862 = vmatprep.subr.bf16.mxu0 %v4909_v48  ;;  %v4984_v47 = vld [vmem:[%s6669_s9 + $0x83c] ss:$36 sps:$4 sm:$0xff]   ;;  %v4987_v48 = vld [vmem:[%s6669_s9 + $0x844] ss:$36 sps:$4 sm:$0xff]  }
 0x183   :  { %2731 = vmatmul.mubr.bf16.vlgmr.msra.gmra.mrb[8].mxu1 %v5510_v39 }
 0x184   :  { %2854 = vmatmul.mubr.bf16.vlgmr.msra.gmra.mrb[12].mxu0 %v5510_v39  ;;  %2740 = vmatpush1.bf16.msra.mxu1 %v4904_v50  ;;  %v4982_v50 = vld [vmem:[%s6669_s9 + $0x838] ss:$36 sps:$4 sm:$0xff]  }
 0x185   :  { %2771 = vmatprep.mubr.bf16.mxu1 %v5520_v42  ;;  %2863 = vmatpush1.bf16.msra.mxu0 %v4907_v51  ;;  %v4985_v51 = vld [vmem:[%s6669_s9 + $0x840] ss:$36 sps:$4 sm:$0xff]  }
 0x186   :  { %2894 = vmatprep.mubr.bf16.mxu0 %v5520_v42  ;;  %2741 = vmatprep.subr.bf16.mxu1 %v4912_v52  ;;  %v4990_v52 = vld [vmem:[%s6669_s9 + $0x884] ss:$36 sps:$4 sm:$0xff]  }
 0x187   :  { %2864 = vmatprep.subr.bf16.mxu0 %v4915_v53  ;;  %v4993_v53 = vld [vmem:[%s6669_s9 + $0x88c] ss:$36 sps:$4 sm:$0xff]  }
 0x188   :  { %2742 = vmatpush1.bf16.msra.mxu1 %v4910_v54  ;;  %v4988_v54 = vld [vmem:[%s6669_s9 + $0x880] ss:$36 sps:$4 sm:$0xff]  }
 0x189   :  { %2865 = vmatpush1.bf16.msra.mxu0 %v4913_v55  ;;  %2743 = vmatprep.subr.bf16.mxu1 %v4918_v56  ;;  %v4991_v55 = vld [vmem:[%s6669_s9 + $0x888] ss:$36 sps:$4 sm:$0xff]  }
 0x18a   :  { %2866 = vmatprep.subr.bf16.mxu0 %v4921_v57  ;;  %v4996_v56 = vld [vmem:[%s6669_s9 + $0x8cc] ss:$36 sps:$4 sm:$0xff]   ;;  %v4999_v57 = vld [vmem:[%s6669_s9 + $0x8d4] ss:$36 sps:$4 sm:$0xff]  }
 0x18c   :  { %2744 = vmatpush1.bf16.msra.mxu1 %v4916_v27  ;;  %v4994_v27 = vld [vmem:[%s6669_s9 + $0x8c8] ss:$36 sps:$4 sm:$0xff]  }
 0x18d   :  { %2867 = vmatpush1.bf16.msra.mxu0 %v4919_v59  ;;  %2745 = vmatprep.subr.bf16.mxu1 %v4924_v60  ;;  %v4997_v59 = vld [vmem:[%s6669_s9 + $0x8d0] ss:$36 sps:$4 sm:$0xff]  }
 0x18e   :  { %2868 = vmatprep.subr.bf16.mxu0 %v4927_v61  ;;  %v5002_v60 = vld [vmem:[%s6669_s9 + $0x914] ss:$36 sps:$4 sm:$0xff]   ;;  %v5005_v61 = vld [vmem:[%s6669_s9 + $0x91c] ss:$36 sps:$4 sm:$0xff]  }
 0x190   :  { %2746 = vmatpush1.bf16.msra.mxu1 %v4922_v62  ;;  %v5000_v62 = vld [vmem:[%s6669_s9 + $0x910] ss:$36 sps:$4 sm:$0xff]  }
 0x191   :  { %2869 = vmatpush1.bf16.msra.mxu0 %v4925_v63  ;;  %2747 = vmatprep.subr.bf16.mxu1 %v4930_v0  ;;  %v5003_v63 = vld [vmem:[%s6669_s9 + $0x918] ss:$36 sps:$4 sm:$0xff]  }
 0x192   :  { %2870 = vmatprep.subr.bf16.mxu0 %v4933_v1  ;;  %v5008_v0 = vld [vmem:[%s6669_s9 + $0x95c] ss:$36 sps:$4 sm:$0xff]   ;;  %v5011_v1 = vld [vmem:[%s6669_s9 + $0x964] ss:$36 sps:$4 sm:$0xff]  }
 0x194   :  { %2748 = vmatpush1.bf16.msra.mxu1 %v4928_v2  ;;  %v5006_v2 = vld [vmem:[%s6669_s9 + $0x958] ss:$36 sps:$4 sm:$0xff]  }
 0x195   :  { %2871 = vmatpush1.bf16.msra.mxu0 %v4931_v4  ;;  %2749 = vmatprep.subr.bf16.mxu1 %v4936_v5  ;;  %v5009_v4 = vld [vmem:[%s6669_s9 + $0x960] ss:$36 sps:$4 sm:$0xff]  }
 0x196   :  { %2872 = vmatprep.subr.bf16.mxu0 %v4939_v6  ;;  %v5014_v5 = vld [vmem:[%s6669_s9 + $0x9a4] ss:$36 sps:$4 sm:$0xff]   ;;  %v5017_v6 = vld [vmem:[%s6669_s9 + $0x9ac] ss:$36 sps:$4 sm:$0xff]  }
 0x198   :  { %2750 = vmatpush1.bf16.msra.mxu1 %v4934_v7  ;;  %v5012_v7 = vld [vmem:[%s6669_s9 + $0x9a0] ss:$36 sps:$4 sm:$0xff]  }
 0x199   :  { %2873 = vmatpush1.bf16.msra.mxu0 %v4937_v8  ;;  %2751 = vmatprep.subr.bf16.mxu1 %v4942_v9  ;;  %v5015_v8 = vld [vmem:[%s6669_s9 + $0x9a8] ss:$36 sps:$4 sm:$0xff]  }
 0x19a   :  { %2874 = vmatprep.subr.bf16.mxu0 %v4945_v10  ;;  %v5020_v9 = vld [vmem:[%s6669_s9 + $0x9ec] ss:$36 sps:$4 sm:$0xff]   ;;  %v5023_v10 = vld [vmem:[%s6669_s9 + $0x9f4] ss:$36 sps:$4 sm:$0xff]  }
 0x19c   :  { %2752 = vmatpush1.bf16.msra.mxu1 %v4940_v11  ;;  %v5018_v11 = vld [vmem:[%s6669_s9 + $0x9e8] ss:$36 sps:$4 sm:$0xff]  }
 0x19d   :  { %2875 = vmatpush1.bf16.msra.mxu0 %v4943_v12  ;;  %2753 = vmatprep.subr.bf16.mxu1 %v4948_v13  ;;  %v5021_v12 = vld [vmem:[%s6669_s9 + $0x9f0] ss:$36 sps:$4 sm:$0xff]  }
 0x19e   :  { %2876 = vmatprep.subr.bf16.mxu0 %v4951_v14  ;;  %v5026_v13 = vld [vmem:[%s6669_s9 + $0xa34] ss:$36 sps:$4 sm:$0xff]   ;;  %v5029_v14 = vld [vmem:[%s6669_s9 + $0xa3c] ss:$36 sps:$4 sm:$0xff]  }
 0x1a0   :  { %2754 = vmatpush1.bf16.msra.mxu1 %v4946_v15  ;;  %v5024_v15 = vld [vmem:[%s6669_s9 + $0xa30] ss:$36 sps:$4 sm:$0xff]  }
 0x1a1   :  { %2877 = vmatpush1.bf16.msra.mxu0 %v4949_v16  ;;  %2755 = vmatprep.subr.bf16.mxu1 %v4954_v18  ;;  %v5027_v16 = vld [vmem:[%s6669_s9 + $0xa38] ss:$36 sps:$4 sm:$0xff]  }
 0x1a2   :  { %2878 = vmatprep.subr.bf16.mxu0 %v4957_v19  ;;  %v5032_v18 = vld [vmem:[%s6669_s9 + $0xa7c] ss:$36 sps:$4 sm:$0xff]   ;;  %v5035_v19 = vld [vmem:[%s6669_s9 + $0xa84] ss:$36 sps:$4 sm:$0xff]  }
 0x1a4   :  { %2756 = vmatpush1.bf16.msra.mxu1 %v4952_v20  ;;  %v5030_v20 = vld [vmem:[%s6669_s9 + $0xa78] ss:$36 sps:$4 sm:$0xff]  }
 0x1a5   :  { %2879 = vmatpush1.bf16.msra.mxu0 %v4955_v21  ;;  %2757 = vmatprep.subr.bf16.mxu1 %v4960_v22  ;;  %v5033_v21 = vld [vmem:[%s6669_s9 + $0xa80] ss:$36 sps:$4 sm:$0xff]  }
 0x1a6   :  { %2880 = vmatprep.subr.bf16.mxu0 %v4963_v23  ;;  %v5038_v22 = vld [vmem:[%s6669_s9 + $0xac4] ss:$36 sps:$4 sm:$0xff]   ;;  %v5041_v23 = vld [vmem:[%s6669_s9 + $0xacc] ss:$36 sps:$4 sm:$0xff]  }
 0x1a8   :  { %2758 = vmatpush1.bf16.msra.mxu1 %v4958_v25  ;;  %v5036_v25 = vld [vmem:[%s6669_s9 + $0xac0] ss:$36 sps:$4 sm:$0xff]  }
 0x1a9   :  { %2881 = vmatpush1.bf16.msra.mxu0 %v4961_v26  ;;  %2759 = vmatprep.subr.bf16.mxu1 %v4966_v28  ;;  %v5039_v26 = vld [vmem:[%s6669_s9 + $0xac8] ss:$36 sps:$4 sm:$0xff]  }
 0x1aa   :  { %2882 = vmatprep.subr.bf16.mxu0 %v4969_v29  ;;  %v5044_v28 = vld [vmem:[%s6669_s9 + $0xb0c] ss:$36 sps:$4 sm:$0xff]   ;;  %v5047_v29 = vld [vmem:[%s6669_s9 + $0xb14] ss:$36 sps:$4 sm:$0xff]  }
 0x1ac   :  { %2760 = vmatpush1.bf16.msra.mxu1 %v4964_v30  ;;  %v5042_v30 = vld [vmem:[%s6669_s9 + $0xb08] ss:$36 sps:$4 sm:$0xff]  }
 0x1ad   :  { %2883 = vmatpush1.bf16.msra.mxu0 %v4967_v24  ;;  %2761 = vmatprep.subr.bf16.mxu1 %v4972_v43  ;;  %v5045_v24 = vld [vmem:[%s6669_s9 + $0xb10] ss:$36 sps:$4 sm:$0xff]   ;;  %v5048_v43 = vld [vmem:[%s6669_s9 + $0x260] ss:$36 sps:$4 sm:$0xff]  }
 0x1ae   :  { %2884 = vmatprep.subr.bf16.mxu0 %v4975_v36  ;;  %v5049_v36 = vld [vmem:[%s6669_s9 + $0x6e0] ss:$36 sps:$4 sm:$0xff]  }
 0x1b0   :  { %2762 = vmatpush1.bf16.msra.mxu1 %v4970_v37  ;;  %v5050_v37 = vld [vmem:[%s6669_s9 + $0x20] ss:$36 sps:$4 sm:$0xff]  }
 0x1b1   :  { %2885 = vmatpush1.bf16.msra.mxu0 %v4973_v40  ;;  %2763 = vmatprep.subr.bf16.mxu1 %v4978_v41  ;;  %v5051_v40 = vld [vmem:[%s6669_s9 + $0x4a0] ss:$36 sps:$4 sm:$0xff]   ;;  %v5052_v41 = vld [vmem:[%s6669_s9 + $0x2a8] ss:$36 sps:$4 sm:$0xff]  }
 0x1b2   :  { %2886 = vmatprep.subr.bf16.mxu0 %v4981_v44  ;;  %v5053_v44 = vld [vmem:[%s6669_s9 + $0x728] ss:$36 sps:$4 sm:$0xff]  }
 0x1b4   :  { %2764 = vmatpush1.bf16.msra.mxu1 %v4976_v45  ;;  %v5054_v45 = vld [vmem:[%s6669_s9 + $0x68] ss:$36 sps:$4 sm:$0xff]  }
 0x1b5   :  { %2887 = vmatpush1.bf16.msra.mxu0 %v4979_v46  ;;  %2765 = vmatprep.subr.bf16.mxu1 %v4984_v47  ;;  %v5055_v46 = vld [vmem:[%s6669_s9 + $0x4e8] ss:$36 sps:$4 sm:$0xff]   ;;  %v5056_v47 = vld [vmem:[%s6669_s9 + $0x2f0] ss:$36 sps:$4 sm:$0xff]  }
 0x1b6   :  { %2888 = vmatprep.subr.bf16.mxu0 %v4987_v48  ;;  %v5057_v48 = vld [vmem:[%s6669_s9 + $0x770] ss:$36 sps:$4 sm:$0xff]  }
 0x1b8   :  { %2766 = vmatpush1.bf16.msra.mxu1 %v4982_v50  ;;  %v5059_v50 = vld [vmem:[%s6669_s9 + $0x530] ss:$36 sps:$4 sm:$0xff]  }
 0x1b9   :  { %2889 = vmatpush1.bf16.msra.mxu0 %v4985_v51  ;;  %2767 = vmatprep.subr.bf16.mxu1 %v4990_v52  ;;  %v5061_v51 = vld [vmem:[%s6669_s9 + $0x7b8] ss:$36 sps:$4 sm:$0xff]  }
 0x1ba   :  { %2890 = vmatprep.subr.bf16.mxu0 %v4993_v53  ;;  %v5062_v52 = vld [vmem:[%s6669_s9 + $0xf8] ss:$36 sps:$4 sm:$0xff]  }
 0x1bb   :  { %v5063_v53 = vld [vmem:[%s6669_s9 + $0x578] ss:$36 sps:$4 sm:$0xff]  }
 0x1bc   :  { %2768 = vmatpush1.bf16.msra.mxu1 %v4988_v54  ;;  %v5064_v54 = vld [vmem:[%s6669_s9 + $0x380] ss:$36 sps:$4 sm:$0xff]  }
 0x1bd   :  { %2891 = vmatpush1.bf16.msra.mxu0 %v4991_v55  ;;  %2769 = vmatprep.subr.bf16.mxu1 %v4996_v56  ;;  %v5065_v55 = vld [vmem:[%s6669_s9 + $0x800] ss:$36 sps:$4 sm:$0xff]  }
 0x1be   :  { %2892 = vmatprep.subr.bf16.mxu0 %v4999_v57  ;;  %v5066_v56 = vld [vmem:[%s6669_s9 + $0x140] ss:$36 sps:$4 sm:$0xff]  }
 0x1bf   :  { %v5067_v57 = vld [vmem:[%s6669_s9 + $0x5c0] ss:$36 sps:$4 sm:$0xff]  }
 0x1c0   :  { %2770 = vmatpush1.bf16.msra.mxu1 %v4994_v27  ;;  %v5068_v27 = vld [vmem:[%s6669_s9 + $0x3c8] ss:$36 sps:$4 sm:$0xff]  }
 0x1c1   :  { %2893 = vmatpush1.bf16.msra.mxu0 %v4997_v59  ;;  %2780 = vmatprep.subr.bf16.mxu1 %v5002_v60  ;;  %v5069_v59 = vld [vmem:[%s6669_s9 + $0x848] ss:$36 sps:$4 sm:$0xff]  }
 0x1c2   :  { %2903 = vmatprep.subr.bf16.mxu0 %v5005_v61  ;;  %v5070_v60 = vld [vmem:[%s6669_s9 + $0x188] ss:$36 sps:$4 sm:$0xff]  }
 0x1c3   :  { %2772 = vmatmul.mubr.bf16.vlgmr.msra.gmra.mrb[8].mxu1 %v5718_v58  ;;  %v5071_v61 = vld [vmem:[%s6669_s9 + $0x608] ss:$36 sps:$4 sm:$0xff]  }
 0x1c4   :  { %2895 = vmatmul.mubr.bf16.vlgmr.msra.gmra.mrb[12].mxu0 %v5718_v58  ;;  %2781 = vmatpush1.bf16.msra.mxu1 %v5000_v62  ;;  %v5072_v62 = vld [vmem:[%s6669_s9 + $0x410] ss:$36 sps:$4 sm:$0xff]  }
 0x1c5   :  { %2904 = vmatpush1.bf16.msra.mxu0 %v5003_v63  ;;  %2782 = vmatprep.subr.bf16.mxu1 %v5008_v0  ;;  %v5073_v63 = vld [vmem:[%s6669_s9 + $0x890] ss:$36 sps:$4 sm:$0xff]  }
 0x1c6   :  { %2905 = vmatprep.subr.bf16.mxu0 %v5011_v1  ;;  %2812 = vmatprep.mubr.bf16.mxu1 %v5163_v3  ;;  %v5074_v0 = vld [vmem:[%s6669_s9 + $0x1d0] ss:$36 sps:$4 sm:$0xff]  }
 0x1c7   :  { %2935 = vmatprep.mubr.bf16.mxu0 %v5163_v3  ;;  %v5075_v1 = vld [vmem:[%s6669_s9 + $0x650] ss:$36 sps:$4 sm:$0xff]  }
 0x1c8   :  { %2783 = vmatpush1.bf16.msra.mxu1 %v5006_v2  ;;  %v5076_v2 = vld [vmem:[%s6669_s9 + $0x458] ss:$36 sps:$4 sm:$0xff]  }
 0x1c9   :  { %2906 = vmatpush1.bf16.msra.mxu0 %v5009_v4  ;;  %2784 = vmatprep.subr.bf16.mxu1 %v5014_v5  ;;  %v5077_v4 = vld [vmem:[%s6669_s9 + $0x8d8] ss:$36 sps:$4 sm:$0xff]  }
 0x1ca   :  { %2907 = vmatprep.subr.bf16.mxu0 %v5017_v6  ;;  %v5078_v5 = vld [vmem:[%s6669_s9 + $0x218] ss:$36 sps:$4 sm:$0xff]  }
 0x1cb   :  { %v5079_v6 = vld [vmem:[%s6669_s9 + $0x698] ss:$36 sps:$4 sm:$0xff]  }
 0x1cc   :  { %2785 = vmatpush1.bf16.msra.mxu1 %v5012_v7  ;;  %v5080_v7 = vld [vmem:[%s6669_s9 + $0x920] ss:$36 sps:$4 sm:$0xff]  }
 0x1cd   :  { %2908 = vmatpush1.bf16.msra.mxu0 %v5015_v8  ;;  %2786 = vmatprep.subr.bf16.mxu1 %v5020_v9  ;;  %v5081_v8 = vld [vmem:[%s6669_s9 + $0x968] ss:$36 sps:$4 sm:$0xff]   ;;  %v5084_v9 = vld [vmem:[%s6669_s9 + $0xa40] ss:$36 sps:$4 sm:$0xff]  }
 0x1ce   :  { %2909 = vmatprep.subr.bf16.mxu0 %v5023_v10  ;;  %v5085_v10 = vld [vmem:[%s6669_s9 + $0xa88] ss:$36 sps:$4 sm:$0xff]  }
 0x1d0   :  { %2787 = vmatpush1.bf16.msra.mxu1 %v5018_v11 }
 0x1d1   :  { %2910 = vmatpush1.bf16.msra.mxu0 %v5021_v12  ;;  %2788 = vmatprep.subr.bf16.mxu1 %v5026_v13 }
 0x1d2   :  { %2911 = vmatprep.subr.bf16.mxu0 %v5029_v14 }
 0x1d4   :  { %2789 = vmatpush1.bf16.msra.mxu1 %v5024_v15 }
 0x1d5   :  { %2912 = vmatpush1.bf16.msra.mxu0 %v5027_v16  ;;  %2790 = vmatprep.subr.bf16.mxu1 %v5032_v18 }
 0x1d6   :  { %2913 = vmatprep.subr.bf16.mxu0 %v5035_v19 }
 0x1d8   :  { %2791 = vmatpush1.bf16.msra.mxu1 %v5030_v20  ;;  %v5086_v20 = vld [vmem:[%s6669_s9 + $0xad0] ss:$36 sps:$4 sm:$0xff]  }
 0x1d9   :  { %2914 = vmatpush1.bf16.msra.mxu0 %v5033_v21  ;;  %2792 = vmatprep.subr.bf16.mxu1 %v5038_v22 }
 0x1da   :  { %2915 = vmatprep.subr.bf16.mxu0 %v5041_v23  ;;  %v5087_v23 = vld [vmem:[%s6669_s9 + $0xb18] ss:$36 sps:$4 sm:$0xff]  }
 0x1dc   :  { %2793 = vmatpush1.bf16.msra.mxu1 %v5036_v25 }
 0x1dd   :  { %2916 = vmatpush1.bf16.msra.mxu0 %v5039_v26  ;;  %2794 = vmatprep.subr.bf16.mxu1 %v5044_v28 }
 0x1de   :  { %2917 = vmatprep.subr.bf16.mxu0 %v5047_v29 }
 0x1e0   :  { %2795 = vmatpush1.bf16.msra.mxu1 %v5042_v30 }
 0x1e1   :  { %2918 = vmatpush1.bf16.msra.mxu0 %v5045_v24  ;;  %4372 = vmatprep.subr.bf16.mxu1 %v5048_v43 }
 0x1e2   :  { %4394 = vmatprep.subr.bf16.mxu0 %v5049_v36 }
 0x1e3   :  { %2813 = vmatmul.mubr.bf16.vlgmr.msra.gmra.mrb[8].mxu1 %v5819_v32 }
 0x1e4   :  { %2936 = vmatmul.mubr.bf16.vlgmr.msra.gmra.mrb[12].mxu0 %v5819_v32  ;;  %4373 = vmatpush3.bf16.msra.mxu1 %v5050_v37 }
 0x1e5   :  { %2976 = vmatprep.mubr.bf16.mxu1 %v5500_v35  ;;  %4395 = vmatpush3.bf16.msra.mxu0 %v5051_v40  ;;  %v5058_v35 = vld [vmem:[%s6669_s9 + $0xb0] ss:$36 sps:$4 sm:$0xff]  }
 0x1e6   :  { %3016 = vmatprep.mubr.bf16.mxu0 %v5520_v42  ;;  %4374 = vmatprep.subr.bf16.mxu1 %v5052_v41  ;;  %v5060_v42 = vld [vmem:[%s6669_s9 + $0x338] ss:$36 sps:$4 sm:$0xff]  }
 0x1e7   :  { %4396 = vmatprep.subr.bf16.mxu0 %v5053_v44 }
 0x1e8   :  { %4375 = vmatpush3.bf16.msra.mxu1 %v5054_v45 }
 0x1e9   :  { %4397 = vmatpush3.bf16.msra.mxu0 %v5055_v46  ;;  %4376 = vmatprep.subr.bf16.mxu1 %v5056_v47 }
 0x1ea   :  { %4398 = vmatprep.subr.bf16.mxu0 %v5057_v48 }
 0x1ec   :  { %4377 = vmatpush3.bf16.msra.mxu1 %v5058_v35 }
 0x1ed   :  { %4399 = vmatpush3.bf16.msra.mxu0 %v5059_v50  ;;  %4378 = vmatprep.subr.bf16.mxu1 %v5060_v42 }
 0x1ee   :  { %4400 = vmatprep.subr.bf16.mxu0 %v5061_v51 }
 0x1f0   :  { %4379 = vmatpush3.bf16.msra.mxu1 %v5062_v52 }
 0x1f1   :  { %4401 = vmatpush3.bf16.msra.mxu0 %v5063_v53  ;;  %4380 = vmatprep.subr.bf16.mxu1 %v5064_v54 }
 0x1f2   :  { %4402 = vmatprep.subr.bf16.mxu0 %v5065_v55 }
 0x1f4   :  { %4381 = vmatpush3.bf16.msra.mxu1 %v5066_v56 }
 0x1f5   :  { %4403 = vmatpush3.bf16.msra.mxu0 %v5067_v57  ;;  %4382 = vmatprep.subr.bf16.mxu1 %v5068_v27 }
 0x1f6   :  { %4404 = vmatprep.subr.bf16.mxu0 %v5069_v59  ;;  %v3064_v59 = vld [vmem:[%s6670_s3] sm:$0xf] }
 0x1f8   :  { %4383 = vmatpush3.bf16.msra.mxu1 %v5070_v60  ;;  %v3131_v60 = vlaneseq }
 0x1f9   :  { %4405 = vmatpush3.bf16.msra.mxu0 %v5071_v61  ;;  %4384 = vmatprep.subr.bf16.mxu1 %v5072_v62 }
 0x1fa   :  { %4406 = vmatprep.subr.bf16.mxu0 %v5073_v63  ;;  %v3132_v61 = vshrl.u32 %v3131_v60, 7  ;;  %v3307_v62 = vand.u32 127, %v3131_v60 }
 0x1fc   :  { %4385 = vmatpush3.bf16.msra.mxu1 %v5074_v0  ;;  %v6456_v63 = vsub.s32 %v3307_v62, %v3132_v61  ;;  %v5166_v0 = vmov 1966171168  }
 0x1fd   :  { %4407 = vmatpush3.bf16.msra.mxu0 %v5075_v1  ;;  %4386 = vmatprep.subr.bf16.mxu1 %v5076_v2  ;;  %v3129_v1 = vunpack.c.l.s4 %v5166_v0 }
 0x1fe   :  { %4408 = vmatprep.subr.bf16.mxu0 %v5077_v4 }
 0x1ff   :  { %v3130_v2 = vunpack.c.0.s8 %v3129_v1 }
 0x200   :  { %4387 = vmatpush3.bf16.msra.mxu1 %v5078_v5  ;;  %v3074_v5 = vpop.permute.xlu0 %3073 }
 0x201   :  { %4409 = vmatpush3.bf16.msra.mxu0 %v5079_v6  ;;  %4449 = vmatprep.subr.bf16.mxu1 %v5164_v17  ;;  %v3133_v4 = vsub.s32 %v3130_v2, %v3132_v61 }
 0x202   :  { %4469 = vmatprep.subr.bf16.mxu0 %v5164_v17 }
 0x203   :  { %2977 = vmatmul.mubr.bf16.vlgmr.msra.gmra.mrb[12].mxu1 %v5510_v39  ;;  %v5082_v39 = vld [vmem:[%s6669_s9 + $0x9b0] ss:$36 sps:$4 sm:$0xff]  }
 0x204   :  { %3017 = vmatmul.mubr.bf16.vlgmr.msra.gmra.mrb[16].mxu0 %v5718_v58  ;;  %4450 = vmatpush3.bf16.msra.mxu1 %v5080_v7  ;;  %v5083_v58 = vld [vmem:[%s6669_s9 + $0x9f8] ss:$36 sps:$4 sm:$0xff]  }
 0x205   :  { %4451 = vmatprep.subr.bf16.mxu1 %v5164_v17  ;;  %4465 = vmatprep.mubr.msk.bf16.mxu1 %vm5165_vm1, %v5164_v17 }
 0x206   :  { %4479 = vmatprep.mubr.msk.bf16.mxu0 %vm5165_vm1, %v5164_v17 }
 0x208   :  { %4452 = vmatpush3.bf16.msra.mxu1 %v5081_v8 }
 0x209   :  { %4453 = vmatprep.subr.bf16.mxu1 %v5164_v17 }
 0x20c   :  { %4454 = vmatpush3.bf16.msra.mxu1 %v5082_v39 }
 0x20d   :  { %4455 = vmatprep.subr.bf16.mxu1 %v5164_v17 }
 0x210   :  { %4456 = vmatpush3.bf16.msra.mxu1 %v5083_v58 }
 0x211   :  { %4457 = vmatprep.subr.bf16.mxu1 %v5164_v17 }
 0x214   :  { %4458 = vmatpush3.bf16.msra.mxu1 %v5084_v9 }
 0x215   :  { %4459 = vmatprep.subr.bf16.mxu1 %v5164_v17 }
 0x216   :  { %v2568_v11 = vpop.f32.mrb[4].mxu1  ;;  %v2691_v12 = vpop.f32.mrb[8].mxu0 }
 0x217   :  { %v2570_v13 = vpop.f32.mrb[5].mxu1  ;;  %v2693_v14 = vpop.f32.mrb[9].mxu0 }
 0x218   :  { %v3065_v15 = vpack.c.bf16 %v2570_v13, %v2568_v11  ;;  %v3066_v16 = vpack.c.bf16 %v2693_v14, %v2691_v12  ;;  %v2572_v18 = vpop.f32.mrb[6].mxu1  ;;  %v2695_v19 = vpop.f32.mrb[10].mxu0  ;;  %4460 = vmatpush3.bf16.msra.mxu1 %v5085_v10  ;;  %v3180_v10 = vsub.s32 0, %v3132_v61  ;;  %v3124_v12 = vld [vmem:[%s6671_s10] sm:$0xf]  ;;  %s5171_s10 = smov 20  }
 0x219   :  { %v2573_v21 = vpop.f32.mrb[7].mxu1  ;;  %v2696_v22 = vpop.f32.mrb[11].mxu0  ;;  %4461 = vmatprep.subr.bf16.mxu1 %v5164_v17  ;;  %vm3125_vm4 = vcmp.gt.f32.partialorder %v3124_v12, 0.5 }
 0x21a   :  { %4470 = vmatpush3.bf16.msra.mxu0 %v3065_v15 }
 0x21b   :  { %4471 = vmatprep.subr.bf16.mxu0 %v5164_v17 }
 0x21c   :  { %4462 = vmatpush3.bf16.msra.mxu1 %v5086_v20 }
 0x21d   :  { %4463 = vmatprep.subr.bf16.mxu1 %v5164_v17 }
 0x21e   :  { %4472 = vmatpush3.bf16.msra.mxu0 %v3066_v16 }
 0x21f   :  { %4473 = vmatprep.subr.bf16.mxu0 %v5164_v17 }
 0x220   :  { %4464 = vmatpush3.bf16.msra.mxu1 %v5087_v23 }
 0x223   :  { %4466 = vmatmul.mubr.bf16.vlgmr.msra.gmra.mrb[16].mxu1 %v5819_v32 }
 0x224   :  { %3631 = vmatprep.mubr.bf16.mxu1 %v5163_v3 }
 0x2b6   :  { %v2814_v25 = vpop.f32.mrb[8].mxu1 }
 0x2b7   :  { %v2937_v26 = vpop.f32.mrb[12].mxu0  ;;  %v2816_v28 = vpop.f32.mrb[9].mxu1 }
 0x2b8   :  { %v3067_v29 = vpack.c.bf16 %v2816_v28, %v2814_v25  ;;  %v2939_v30 = vpop.f32.mrb[13].mxu0  ;;  %v2818_v24 = vpop.f32.mrb[10].mxu1 }
 0x2b9   :  { %v3068_v43 = vpack.c.bf16 %v2939_v30, %v2937_v26  ;;  %v2941_v36 = vpop.f32.mrb[14].mxu0  ;;  %v2819_v37 = vpop.f32.mrb[11].mxu1 }
 0x2ba   :  { %v2942_v40 = vpop.f32.mrb[15].mxu0  ;;  %4474 = vmatpush3.bf16.msra.mxu0 %v3067_v29 }
 0x2bb   :  { %4475 = vmatprep.subr.bf16.mxu0 %v5164_v17 }
 0x2be   :  { %4476 = vmatpush3.bf16.msra.mxu0 %v3068_v43 }
 0x2bf   :  { %4477 = vmatprep.subr.bf16.mxu0 %v5164_v17 }
 0x2d6   :  { %v4388_v41 = vpop.f32.mrb[12].mxu1 }
 0x2d7   :  { %v4410_v32 = vpop.f32.mrb[16].mxu0  ;;  %v4389_v44 = vpop.f32.mrb[13].mxu1 }
 0x2d8   :  { %v4390_v45 = vadd.f32 %v4389_v44, %v4388_v41  ;;  %v4411_v46 = vpop.f32.mrb[17].mxu0  ;;  %v4391_v47 = vpop.f32.mrb[14].mxu1 }
 0x2d9   :  { %v4412_v48 = vadd.f32 %v4411_v46, %v4410_v32  ;;  %v4413_v35 = vpop.f32.mrb[18].mxu0  ;;  %v4392_v50 = vpop.f32.mrb[15].mxu1 }
 0x2da   :  { %v4414_v42 = vpop.f32.mrb[19].mxu0 }
 0x2db   :  { %v3019_v51 = vadd.f32 %v4412_v48, %v4390_v45 }
 0x2f6   :  { %v3058_v52 = vpop.f32.mrb[16].mxu1 }
 0x2f7   :  { %v3059_v53 = vadd.f32 %v3058_v52, %v3019_v51  ;;  %v4467_v54 = vpop.f32.mrb[17].mxu1 }
 0x2f8   :  { %v3061_v55 = vpop.f32.mrb[18].mxu1 }
 0x2f9   :  { %v3069_v56 = vpack.c.bf16 %v3059_v53, %v3059_v53  ;;  %v4468_v57 = vpop.f32.mrb[19].mxu1 }
 0x2fb   :  { %v3082_v27 = vsel %vm3080_vm2, %v3069_v56, 0 }
 0x2fc   :  { %4478 = vmatpush3.bf16.msra.mxu0 %v3082_v27 }
 0x2fd   :  { %4483 = vmatprep.subr.bf16.mxu0 %v5164_v17 }
 0x2ff   :  { %4480 = vmatmul.mubr.msk.bf16.vlgmr.msra.gmra.mrb[20].mxu0 %vm3076_vm3, %v3064_v59  ;;  %vm3484_vm3 = vcmask 162816  }
 0x300   :  { %4485 = vmatprep.mubr.msk.bf16.mxu0 %vm5165_vm1, %v5164_v17 }
 0x3d2   :  { %v3118_v6 = vpop.f32.mrb[20].mxu0 }
 0x3d3   :  { %v3119_v7 = vadd.f32 %v3118_v6, %v3074_v5  ;;  %v4481_v8 = vpop.f32.mrb[21].mxu0 }
 0x3d4   :  { %v3121_v39 = vpop.f32.mrb[22].mxu0 }
 0x3d5   :  { %v3127_v58 = vcombine.high %v3119_v7, %v3119_v7  ;;  %v3134_v9 = vrot.slane %v3119_v7, %v3133_v4  ;;  %v4482_v11 = vpop.f32.mrb[23].mxu0 }
 0x3d7   :  { %v3141_v13 = vrot.slane %v3127_v58, %v3133_v4  ;;  %v3142_v14 = vcombine.high %v3134_v9, %v3134_v9  ;;  %v3150_v15 = vrot.slane %v3134_v9, %v3133_v4 }
 0x3d9   :  { %v3181_v16 = vrot.slane %v3150_v15, %v3180_v10  ;;  %v3172_v18 = vcombine.high %v3150_v15, %v3150_v15  ;;  %v3164_v19 = vrot.slane %v3142_v14, %v3133_v4  ;;  %v3157_v20 = vrot.slane %v3141_v13, %v3133_v4 }
 0x3da   :  { %v3143_v25 = vcombine.high %v3141_v13, %v3141_v13 }
 0x3db   :  { %v3218_v21 = vsel %vm3125_vm4, %v3181_v16, -inf  ;;  %v3189_v22 = vrot.slane %v3172_v18, %v3180_v10  ;;  %v3185_v23 = vrot.slane %v3164_v19, %v3180_v10  ;;  %v3197_v30 = vrot.slane %v3157_v20, %v3180_v10 }
 0x3dc   :  { %v3226_v26 = vsel %vm3080_vm2, %v3218_v21, -inf  ;;  %v3174_v24 = vcombine.high %v3164_v19, %v3164_v19  ;;  %v3171_v41 = vrot.slane %v3143_v25, %v3133_v4  ;;  %v3173_v46 = vcombine.high %v3157_v20, %v3157_v20 }
 0x3dd   :  { %3227 = vmax.xlane.f32.xlu1 %v3226_v26  ;;  %v3220_v28 = vsel %vm3125_vm4, %v3189_v22, -inf  ;;  %v3219_v29 = vsel %vm3125_vm4, %v3185_v23, -inf  ;;  %v3222_v37 = vsel %vm3125_vm4, %v3197_v30, -inf }
 0x3de   :  { %v3232_v43 = vsel %vm3080_vm2, %v3220_v28, -inf  ;;  %v3229_v36 = vsel %vm3080_vm2, %v3219_v29, -inf  ;;  %v3193_v40 = vrot.slane %v3174_v24, %v3180_v10  ;;  %v3238_v32 = vsel %vm3080_vm2, %v3222_v37, -inf }
 0x3df   :  { %3233 = vmax.xlane.f32.xlu0 %v3232_v43  ;;  %v3201_v45 = vrot.slane %v3171_v41, %v3180_v10  ;;  %v3205_v35 = vrot.slane %v3173_v46, %v3180_v10  ;;  %v3175_v50 = vcombine.high %v3171_v41, %v3171_v41  ;;  %v5088_v41 = vld [vmem:[%s6672_s5] sm:$0xff]  }
 0x3e0   :  { %v3221_v44 = vsel %vm3125_vm4, %v3193_v40, -inf }
 0x3e1   :  { %3230 = vmax.xlane.f32.xlu1 %v3229_v36  ;;  %v3235_v47 = vsel %vm3080_vm2, %v3221_v44, -inf  ;;  %v3223_v48 = vsel %vm3125_vm4, %v3201_v45, -inf  ;;  %v3224_v51 = vsel %vm3125_vm4, %v3205_v35, -inf  ;;  %v3209_v52 = vrot.slane %v3175_v50, %v3180_v10  ;;  %v5091_v44 = vld [vmem:[%s6672_s5 + $0x18] sm:$0xff]   ;;  %v5092_v45 = vld [vmem:[%s6672_s5 + $0x20] ss:$0 sps:$4 sm:$0xff]  }
 0x3e2   :  { %v3241_v42 = vsel %vm3080_vm2, %v3223_v48, -inf  ;;  %v3244_v53 = vsel %vm3080_vm2, %v3224_v51, -inf  ;;  %v5093_v51 = vld [vmem:[%s6673_s11] ss:$20 sps:$4 sm:$0xff]  }
 0x3e3   :  { %v3225_v54 = vsel %vm3125_vm4, %v3209_v52, -inf  ;;  %vm3486_vm4 = vcmask 195584  }
 0x3e4   :  { %v3247_v55 = vsel %vm3080_vm2, %v3225_v54, -inf }
 0x3e5   :  { %3239 = vmax.xlane.f32.xlu1 %v3238_v32  ;;  %v5090_v32 = vld [vmem:[%s6672_s5 + $0x10] sm:$0xff]  }
 0x3e9   :  { %3236 = vmax.xlane.f32.xlu1 %v3235_v47 }
 0x3ed   :  { %3242 = vmax.xlane.f32.xlu1 %v3241_v42 }
 0x3f1   :  { %3245 = vmax.xlane.f32.xlu1 %v3244_v53  ;;  %v5095_v53 = vld [vmem:[%s6673_s11 + $0x4] ss:$20 sps:$4 sm:$0xff]  }
 0x3f2   :  { %3599 = vmatprep.subr.bf16.mxu1 %v5095_v53 }
 0x3f3   :  { %3600 = vmatpush1.bf16.msra.mxu1 %v5093_v51 }
 0x3f5   :  { %3248 = vmax.xlane.f32.xlu1 %v3247_v55  ;;  %v5096_v55 = vld [vmem:[%s6673_s11 + $0x28] ss:$20 sps:$4 sm:$0xff]  }
 0x46a   :  { %v3228_v56 = vpop.xlane.xlu1 %3227 }
 0x46b   :  { %v3259_v60 = vpack.c.bf16 %v3228_v56, %v3228_v56  ;;  %v5098_v56 = vld [vmem:[%s6673_s11 + $0x2c] ss:$20 sps:$4 sm:$0xff]  }
 0x46c   :  { %v3234_v61 = vpop.xlane.xlu0 %3233  ;;  %3601 = vmatprep.subr.bf16.mxu1 %v5098_v56 }
 0x46d   :  { %v3261_v2 = vpack.c.bf16 %v3234_v61, %v3234_v61  ;;  %v3298_v4 = vunpack.c.l.b16 %v3259_v60  ;;  %3602 = vmatpush1.bf16.msra.mxu1 %v5096_v55 }
 0x46e   :  { %v3231_v57 = vpop.xlane.xlu1 %3230 }
 0x46f   :  { %v3260_v59 = vpack.c.bf16 %v3231_v57, %v3231_v57  ;;  %v3300_v39 = vunpack.c.l.b16 %v3261_v2  ;;  %v3311_v9 = vrot.slane %v3298_v4, %v6456_v63  ;;  %v3505_v57 = vld [vmem:[%s6673_s11 + $0x50] sm:$0x33]  ;;  %v5103_v2 = vld [vmem:[%s6673_s11 + $0xc] ss:$20 sps:$4 sm:$0xff]  }
 0x471   :  { %v3299_v0 = vunpack.c.l.b16 %v3260_v59  ;;  %v3319_v15 = vrot.slane %v3300_v39, %v6456_v63  ;;  %v4354_v59 = vcombine.low %v3505_v57, %v3505_v57 }
 0x472   :  { %v3240_v27 = vpop.xlane.xlu1 %3239 }
 0x473   :  { %v3315_v6 = vrot.slane %v3299_v0, %v6456_v63  ;;  %v3263_v58 = vpack.c.bf16 %v3240_v27, %v3240_v27  ;;  %v4355_v27 = vcombine.high %v3505_v57, %v3505_v57  ;;  %v3585_v0 = vsel %vm3583_vm13, %v4354_v59, 0 }
 0x475   :  { %v3341_v11 = vsel %vm3340_vm5, %v3315_v6, %v3311_v9  ;;  %v3302_v16 = vunpack.c.l.b16 %v3263_v58  ;;  %4359 = vmatprep.subr.msk.bf16.mxu1 %vm3583_vm13, %v4355_v27  ;;  %v3733_v58 = vld [vmem:[%s6674_s8] sm:$0xff]  ;;  %vm3488_vm5 = vcmask 228352  }
 0x476   :  { %v3237_v62 = vpop.xlane.xlu1 %3236  ;;  %v3343_v19 = vsel %vm3342_vm6, %v3319_v15, %v3341_v11  ;;  %3604 = vmatpush1.bf16.msra.mxu1 %v3585_v0  ;;  %vm3490_vm6 = vcmask 261120  }
 0x477   :  { %v3262_v1 = vpack.c.bf16 %v3237_v62, %v3237_v62  ;;  %v3327_v25 = vrot.slane %v3302_v16, %v6456_v63  ;;  %3640 = vmatprep.subr.bf16.mxu1 %v5103_v2 }
 0x479   :  { %v3301_v7 = vunpack.c.l.b16 %v3262_v1 }
 0x47a   :  { %v3243_v5 = vpop.xlane.xlu1 %3242 }
 0x47b   :  { %v3264_v8 = vpack.c.bf16 %v3243_v5, %v3243_v5  ;;  %v3323_v12 = vrot.slane %v3301_v7, %v6456_v63 }
 0x47d   :  { %v3303_v13 = vunpack.c.l.b16 %v3264_v8  ;;  %v3345_v21 = vsel %vm3344_vm7, %v3323_v12, %v3343_v19  ;;  %v60_v8 = vld [vmem:[%s6667_s2 + $0x8] sm:$0xff]  ;;  %v3508_v12 = vld [vmem:[%s6675_s6] sm:$0xff]  ;;  %vm3579_vm7 = vcmask 293888  }
 0x47e   :  { %v3246_v10 = vpop.xlane.xlu1 %3245  ;;  %v3347_v29 = vsel %vm3346_vm8, %v3327_v25, %v3345_v21 }
 0x47f   :  { %v3265_v14 = vpack.c.bf16 %v3246_v10, %v3246_v10  ;;  %v3331_v22 = vrot.slane %v3303_v13, %v6456_v63  ;;  %v3734_v13 = vld [vmem:[%s6674_s8 + $0x8] sm:$0xff] }
 0x481   :  { %v3304_v18 = vunpack.c.l.b16 %v3265_v14  ;;  %v3349_v30 = vsel %vm3348_vm9, %v3331_v22, %v3347_v29 }
 0x482   :  { %v3249_v20 = vpop.xlane.xlu1 %3248 }
 0x483   :  { %v3266_v23 = vpack.c.bf16 %v3249_v20, %v3249_v20  ;;  %v3335_v26 = vrot.slane %v3304_v18, %v6456_v63 }
 0x485   :  { %v3305_v28 = vunpack.c.l.b16 %v3266_v23  ;;  %v3351_v43 = vsel %vm3350_vm10, %v3335_v26, %v3349_v30 }
 0x487   :  { %v3339_v24 = vrot.slane %v3305_v28, %v6456_v63  ;;  %v5089_v63 = vld [vmem:[%s6672_s5 + $0x8] sm:$0xff]  }
 0x489   :  { %v3353_v36 = vsel %vm3352_vm11, %v3339_v24, %v3351_v43 }
 0x48a   :  { %v3354_v37 = vpack.c.b16 %v3353_v36, %v3353_v36  ;;  %v5101_v36 = vld [vmem:[%s6673_s11 + $0x8] ss:$20 sps:$4 sm:$0xff]  }
 0x48c   :  { %v3372_v40 = vsel %vm3080_vm2, %v3354_v37, 0 }
 0x48d   :  { %4484 = vmatpush3.bf16.msra.mxu0 %v3372_v40  ;;  %v5106_v40 = vld [vmem:[%s6673_s11 + $0x34] ss:$20 sps:$4 sm:$0xff]  }
 0x490   :  { %4486 = vmatmul.mubr.msk.bf16.vlgmr.msra.gmra.mrb[24].mxu0 %vm3355_vm12, %v5088_v41  ;;  %v3506_v41 = vld [vmem:[%s6673_s11 + $0x58] sm:$0x33] }
 0x491   :  { %4489 = vmatprep.mubr.msk.bf16.mxu0 %vm5165_vm1, %v5164_v17 }
 0x498   :  { %4490 = vmatmul.mubr.msk.bf16.gmra.mrb[28].mxu0 %vm3355_vm12, %v5089_v63  ;;  %v5104_v63 = vld [vmem:[%s6673_s11 + $0x30] ss:$20 sps:$4 sm:$0xff]  }
 0x499   :  { %4493 = vmatprep.mubr.msk.bf16.mxu0 %vm5165_vm1, %v5164_v17 }
 0x4a0   :  { %4494 = vmatmul.mubr.msk.bf16.gmra.mrb[32].mxu0 %vm3355_vm12, %v5090_v32  ;;  %v4357_v32 = vcombine.high %v3506_v41, %v3506_v41 }
 0x4a1   :  { %4497 = vmatprep.mubr.msk.bf16.mxu0 %vm5165_vm1, %v5164_v17 }
 0x4a8   :  { %4498 = vmatmul.mubr.msk.bf16.gmra.mrb[36].mxu0 %vm3355_vm12, %v5091_v44  ;;  %v4356_v44 = vcombine.low %v3506_v41, %v3506_v41 }
 0x4a9   :  { %4501 = vmatprep.mubr.msk.bf16.mxu0 %vm5165_vm1, %v5164_v17 }
 0x4b0   :  { %4502 = vmatmul.mubr.msk.bf16.gmra.mrb[40].mxu0 %vm3355_vm12, %v5092_v45  ;;  %v3591_v45 = vsel %vm3583_vm13, %v4356_v44, 0 }
 0x4b1   :  { %3800 = vmatprep.mubr.bf16.mxu0 %v5163_v3 }
 0x563   :  { %v6515_v46 = vpop.f32.mrb[24].mxu0 }
 0x564   :  { %v4487_v47 = vpop.f32.mrb[25].mxu0 }
 0x565   :  { %v3411_v48 = vpop.f32.mrb[26].mxu0  ;;  %v5110_v47 = vld [vmem:[%s6673_s11 + $0x38] ss:$20 sps:$4 sm:$0xff]  }
 0x566   :  { %3447 = vrot.lane.b32.xlu1 %v3411_v48, %s5167_s20  ;;  %v4488_v35 = vpop.f32.mrb[27].mxu0  ;;  %v5111_v48 = vld [vmem:[%s6673_s11 + $0x60] ss:$0 sps:$4 sm:$0x33]  }
 0x567   :  { %v3597_v35 = vsel %vm3583_vm13, %v5111_v48, 0 }
 0x56b   :  { %v3416_v50 = vpop.f32.mrb[28].mxu0 }
 0x56c   :  { %3451 = vrot.lane.b32.xlu0 %v3416_v50, %s5168_s21  ;;  %v4491_v42 = vpop.f32.mrb[29].mxu0 }
 0x56d   :  { %v3419_v52 = vpop.f32.mrb[30].mxu0 }
 0x56e   :  { %3455 = vrot.lane.b32.xlu1 %v3419_v52, %s5169_s25  ;;  %v4492_v54 = vpop.f32.mrb[31].mxu0 }
 0x573   :  { %v3424_v60 = vpop.f32.mrb[32].mxu0 }
 0x574   :  { %3459 = vrot.lane.b32.xlu1 %v3424_v60, %s5170_s29  ;;  %v4495_v61 = vpop.f32.mrb[33].mxu0 }
 0x575   :  { %v3427_v62 = vpop.f32.mrb[34].mxu0 }
 0x576   :  { %v4496_v1 = vpop.f32.mrb[35].mxu0 }
 0x578   :  { %3463 = vrot.lane.b32.xlu1 %v3427_v62, %s5171_s10 }
 0x57b   :  { %v3432_v4 = vpop.f32.mrb[36].mxu0 }
 0x57c   :  { %3467 = vrot.lane.b32.xlu1 %v3432_v4, %s5172_s14  ;;  %v4499_v5 = vpop.f32.mrb[37].mxu0 }
 0x57d   :  { %v3435_v6 = vpop.f32.mrb[38].mxu0 }
 0x57e   :  { %3471 = vrot.lane.b32.xlu0 %v3435_v6, %s5173_s15  ;;  %v4500_v7 = vpop.f32.mrb[39].mxu0 }
 0x582   :  { %68 = vperm.xlu0 %4565, %v60_v8  }
 0x583   :  { %v3440_v39 = vpop.f32.mrb[40].mxu0 }
 0x584   :  { %3475 = vrot.lane.b32.xlu1 %v3440_v39, %s5174_s19  ;;  %v4503_v9 = vpop.f32.mrb[41].mxu0 }
 0x585   :  { %v3443_v10 = vpop.f32.mrb[42].mxu0 }
 0x586   :  { %3737 = vperm.xlu0 %4565, %v3733_v58   ;;  %v4504_v11 = vpop.f32.mrb[43].mxu0 }
 0x588   :  { %3511 = vperm.xlu1 %4566, %v3508_v12  }
 0x58c   :  { %3742 = vperm.xlu1 %4566, %v3734_v13  }
 0x5d8   :  { %v3448_v14 = vpop.permute.xlu1 %3447 }
 0x5d9   :  { %v3479_v20 = vsel %vm3478_vm14, %v6515_v46, %v3448_v14  ;;  %v5109_v46 = vld [vmem:[%s6673_s11 + $0x10] ss:$20 sps:$4 sm:$0xff]  }
 0x5de   :  { %v3452_v18 = vpop.permute.xlu0 %3451 }
 0x5df   :  { %v3480_v21 = vsel %vm3355_vm12, %v3479_v20, %v3452_v18 }
 0x5e0   :  { %v3456_v15 = vpop.permute.xlu1 %3455 }
 0x5e1   :  { %v3482_v22 = vsel %vm3481_vm15, %v3480_v21, %v3456_v15 }
 0x5e6   :  { %v3460_v16 = vpop.permute.xlu1 %3459 }
 0x5e7   :  { %v3483_v25 = vsel %vm76_vm0, %v3482_v22, %v3460_v16 }
 0x5ea   :  { %v3464_v19 = vpop.permute.xlu1 %3463 }
 0x5eb   :  { %v3485_v26 = vsel %vm3484_vm3, %v3483_v25, %v3464_v19 }
 0x5ee   :  { %v3468_v23 = vpop.permute.xlu1 %3467 }
 0x5ef   :  { %v3487_v28 = vsel %vm3486_vm4, %v3485_v26, %v3468_v23 }
 0x5f0   :  { %v3472_v29 = vpop.permute.xlu0 %3471 }
 0x5f1   :  { %v3489_v30 = vsel %vm3488_vm5, %v3487_v28, %v3472_v29 }
 0x5f6   :  { %v3476_v24 = vpop.permute.xlu1 %3475 }
 0x5f7   :  { %v3491_v43 = vsel %vm3490_vm6, %v3489_v30, %v3476_v24 }
 0x5f8   :  { %v3492_v37 = vpack.c.bf16 %v3491_v43, %v3491_v43 }
 0x5fa   :  { %4360 = vmatmul.mubr.msk.bf16.vlgmr.msra.gmra.mrb[20].mxu1 %vm3579_vm7, %v3492_v37 }
 0x5fb   :  { %3641 = vmatpush1.bf16.msra.mxu1 %v5101_v36  ;;  %3672 = vmatprep.mubr.bf16.mxu1 %v5163_v3 }
 0x5fc   :  { %3642 = vmatprep.subr.bf16.mxu1 %v5106_v40 }
 0x5ff   :  { %3643 = vmatpush1.bf16.msra.mxu1 %v5104_v63 }
 0x600   :  { %4361 = vmatprep.subr.msk.bf16.mxu1 %vm3583_vm13, %v4357_v32 }
 0x601   :  { %v69_v50 = vpop.permute.xlu0 %68 }
 0x602   :  { %v119_v52 = vadd.f32 %v5493_v31, %v69_v50  ;;  %v121_v55 = vadd.f32 %v5496_v33, %v69_v50  ;;  %v162_v33 = vadd.f32 %v5498_v34, %v69_v50  ;;  %v164_v4 = vadd.f32 %v5508_v38, %v69_v50 }
 0x603   :  { %3645 = vmatpush1.bf16.msra.mxu1 %v3591_v45  ;;  %v204_v11 = vadd.f32 %v5540_v49, %v69_v50 }
 0x604   :  { %4505 = vmatprep.subr.bf16.mxu1 %v5164_v17 }
 0x605   :  { %v3738_v18 = vpop.permute.xlu0 %3737 }
 0x606   :  { %4362 = vmatmul.mubr.msk.bf16.vlgmr.msra.gmra.mrb[24].mxu1 %vm3579_vm7, %v3492_v37 }
 0x607   :  { %4506 = vmatpush3.bf16.msra.mxu1 %v5109_v46  ;;  %4511 = vmatprep.mubr.msk.bf16.mxu1 %vm5165_vm1, %v5164_v17  ;;  %v3512_v42 = vpop.permute.xlu1 %3511 }
 0x608   :  { %4507 = vmatprep.subr.bf16.mxu1 %v5164_v17 }
 0x60b   :  { %4508 = vmatpush3.bf16.msra.mxu1 %v5110_v47  ;;  %v3743_v22 = vpop.permute.xlu1 %3742 }
 0x60c   :  { %4509 = vmatprep.subr.bf16.mxu1 %v5164_v17 }
 0x60f   :  { %4510 = vmatpush3.bf16.msra.mxu1 %v3597_v35 }
 0x612   :  { %4512 = vmatmul.mubr.msk.bf16.vlgmr.msra.gmra.mrb[28].mxu1 %vm3579_vm7, %v3492_v37 }
 0x613   :  { %3843 = vmatprep.mubr.bf16.mxu1 %v5163_v3  ;;  %v5112_v3 = vld [vmem:[%s6676_s7] sm:$0xff]  }
 0x6cd   :  { %v3633_v51 = vpop.f32.mrb[20].mxu1 }
 0x6ce   :  { %v3634_v53 = vadd.f32 %v3633_v51, %v3512_v42  ;;  %v3635_v54 = vpop.f32.mrb[21].mxu1 }
 0x6cf   :  { %v3636_v56 = vadd.f32 %v3635_v54, %v3512_v42  ;;  %v3637_v57 = vpop.f32.mrb[22].mxu1 }
 0x6d0   :  { %v3723_v27 = vadd.f32 %v3634_v53, %v119_v52  ;;  %v3638_v59 = vpop.f32.mrb[23].mxu1 }
 0x6d1   :  { %v3724_v60 = vadd.f32 %v3636_v56, %v121_v55 }
 0x6d2   :  { %v3728_v61 = vpack.c.bf16 %v3723_v27, %v3723_v27 }
 0x6d3   :  { %v3729_v62 = vpack.c.bf16 %v3724_v60, %v3724_v60 }
 0x6d4   :  { %v3754_v0 = vsel %vm3080_vm2, %v3728_v61, 0 }
 0x6d5   :  { %4365 = vmatprep.subr.msk.bf16.mxu0 %vm3080_vm2, %v3729_v62 }
 0x6d6   :  { %3769 = vmatpush1.bf16.msra.mxu0 %v3754_v0 }
 0x6d7   :  { %4515 = vmatprep.subr.bf16.mxu0 %v5164_v17 }
 0x6d9   :  { %v3674_v31 = vpop.f32.mrb[24].mxu1  ;;  %4366 = vmatmul.mubr.msk.bf16.vlgmr.msra.gmra.mrb[44].mxu0 %vm3355_vm12, %v5112_v3 }
 0x6da   :  { %v3675_v1 = vadd.f32 %v3674_v31, %v3512_v42  ;;  %v3676_v2 = vpop.f32.mrb[25].mxu1  ;;  %4517 = vmatprep.mubr.msk.bf16.mxu0 %vm5165_vm1, %v5164_v17 }
 0x6db   :  { %v3677_v5 = vadd.f32 %v3676_v2, %v3512_v42  ;;  %v3678_v6 = vpop.f32.mrb[26].mxu1 }
 0x6dc   :  { %v3725_v7 = vadd.f32 %v3675_v1, %v162_v33  ;;  %v3679_v8 = vpop.f32.mrb[27].mxu1 }
 0x6dd   :  { %v3726_v39 = vadd.f32 %v3677_v5, %v164_v4 }
 0x6de   :  { %v3730_v58 = vpack.c.bf16 %v3725_v7, %v3725_v7 }
 0x6df   :  { %v3731_v9 = vpack.c.bf16 %v3726_v39, %v3726_v39 }
 0x6e0   :  { %v3760_v10 = vsel %vm3080_vm2, %v3730_v58, 0 }
 0x6e1   :  { %4367 = vmatprep.subr.msk.bf16.mxu1 %vm3080_vm2, %v3731_v9 }
 0x6e2   :  { %3812 = vmatpush1.bf16.msra.mxu1 %v3760_v10 }
 0x6e5   :  { %v3715_v34 = vpop.f32.mrb[28].mxu1  ;;  %4368 = vmatmul.mubr.msk.bf16.vlgmr.msra.gmra.mrb[32].mxu1 %vm3355_vm12, %v5112_v3 }
 0x6e6   :  { %v3716_v17 = vadd.f32 %v3715_v34, %v3512_v42  ;;  %v4513_v12 = vpop.f32.mrb[29].mxu1 }
 0x6e7   :  { %v3718_v38 = vpop.f32.mrb[30].mxu1 }
 0x6e8   :  { %v3727_v13 = vadd.f32 %v3716_v17, %v204_v11  ;;  %v4514_v14 = vpop.f32.mrb[31].mxu1  ;;  %v5153_v11 = vld [vmem:[%s6665_s0] sm:$0xff]  ;;  %v5154_v38 = vld [vmem:[%s6665_s0 + $0x8] sm:$0xff] }
 0x6ea   :  { %v3732_v15 = vpack.c.bf16 %v3727_v13, %v3727_v13 }
 0x6ec   :  { %v3766_v16 = vsel %vm3080_vm2, %v3732_v15, 0  ;;  %v5155_v15 = vld [vmem:[%s6665_s0 + $0x28] sm:$0xff] }
 0x6ed   :  { %4516 = vmatpush3.bf16.msra.mxu0 %v3766_v16 }
 0x6f0   :  { %4518 = vmatmul.mubr.msk.bf16.vlgmr.msra.gmra.mrb[48].mxu0 %vm3355_vm12, %v5112_v3 }
 0x7ac   :  { %v3802_v19 = vpop.f32.mrb[44].mxu0 }
 0x7ad   :  { %v3803_v20 = vadd.f32 %v3802_v19, %v3738_v18  ;;  %v3804_v21 = vpop.f32.mrb[45].mxu0  ;;  %v5156_v19 = vld [vmem:[%s6665_s0 + $0x30] sm:$0xff] }
 0x7ae   :  { %v3805_v23 = vadd.f32 %v3804_v21, %v3738_v18  ;;  %v3806_v25 = vpop.f32.mrb[46].mxu0 }
 0x7af   :  { %v3895_v26 = vsub.f32 0.0, %v3803_v20  ;;  %v3807_v49 = vadd.f32 %v3806_v25, %v3743_v22  ;;  %v3808_v28 = vpop.f32.mrb[47].mxu0 }
 0x7b0   :  { %v3896_v29 = vsub.f32 0.0, %v3805_v23  ;;  %v3809_v30 = vadd.f32 %v3808_v28, %v3743_v22 }
 0x7b1   :  { %v3905_v24 = vmul.f32 1.442695, %v3895_v26  ;;  %v3900_v43 = vsub.f32 0.0, %v3807_v49 }
 0x7b2   :  { %v3907_v36 = vmul.f32 1.442695, %v3896_v29  ;;  %v3901_v37 = vsub.f32 0.0, %v3809_v30 }
 0x7b3   :  { %5113 = vpow2.f32 %v3905_v24  ;;  %v3915_v40 = vmul.f32 1.442695, %v3900_v43  ;;  %v5157_v24 = vld [vmem:[%s6665_s0 + $0x10] sm:$0xff] }
 0x7b4   :  { %5115 = vpow2.f32 %v3907_v36  ;;  %v3917_v41 = vmul.f32 1.442695, %v3901_v37 }
 0x7b5   :  { %5117 = vpow2.f32 %v3915_v40 }
 0x7b6   :  { %5119 = vpow2.f32 %v3917_v41  ;;  %v5158_v41 = vld [vmem:[%s6665_s0 + $0x18] sm:$0xff] }
 0x7b8   :  { %v3845_v63 = vpop.f32.mrb[32].mxu1 }
 0x7b9   :  { %v3846_v32 = vadd.f32 %v3845_v63, %v3738_v18  ;;  %v3847_v44 = vpop.f32.mrb[33].mxu1 }
 0x7ba   :  { %v3848_v45 = vadd.f32 %v3847_v44, %v3738_v18  ;;  %v3849_v46 = vpop.f32.mrb[34].mxu1  ;;  %v5159_v44 = vld [vmem:[%s6665_s0 + $0x38] sm:$0xff] }
 0x7bb   :  { %v3897_v47 = vsub.f32 0.0, %v3846_v32  ;;  %v3850_v48 = vadd.f32 %v3849_v46, %v3743_v22  ;;  %v3851_v35 = vpop.f32.mrb[35].mxu1  ;;  %v5160_v46 = vld [vmem:[%s6665_s0 + $0x40] sm:$0xff] }
 0x7bc   :  { %v3898_v50 = vsub.f32 0.0, %v3848_v45  ;;  %v3852_v42 = vadd.f32 %v3851_v35, %v3743_v22  ;;  %v5161_v35 = vld [vmem:[%s6665_s0 + $0x20] sm:$0xff] }
 0x7bd   :  { %v5114_v51 = vpop.eup %5113  ;;  %v3909_v52 = vmul.f32 1.442695, %v3897_v47  ;;  %v3902_v53 = vsub.f32 0.0, %v3850_v48 }
 0x7be   :  { %v5116_v54 = vpop.eup %5115  ;;  %v3925_v55 = vadd.f32 1.0, %v5114_v51  ;;  %v3903_v56 = vsub.f32 0.0, %v3852_v42  ;;  %v3911_v61 = vmul.f32 1.442695, %v3898_v50  ;;  %v5162_v51 = vld [vmem:[%s6665_s0 + $0x48] sm:$0xff] }
 0x7bf   :  { %v5118_v57 = vpop.eup %5117  ;;  %v3926_v27 = vadd.f32 1.0, %v5116_v54  ;;  %5121 = vpow2.f32 %v3909_v52  ;;  %v3919_v0 = vmul.f32 1.442695, %v3902_v53 }
 0x7c0   :  { %v5120_v59 = vpop.eup %5119  ;;  %5123 = vrcp.f32 %v3925_v55  ;;  %v3930_v60 = vadd.f32 1.0, %v5118_v57  ;;  %v3921_v3 = vmul.f32 1.442695, %v3903_v56 }
 0x7c1   :  { %5125 = vrcp.f32 %v3926_v27  ;;  %v3931_v62 = vadd.f32 1.0, %v5120_v59 }
 0x7c2   :  { %5127 = vrcp.f32 %v3930_v60 }
 0x7c3   :  { %5129 = vrcp.f32 %v3931_v62  ;;  %v3888_v31 = vpop.f32.mrb[48].mxu0 }
 0x7c4   :  { %5131 = vpow2.f32 %v3911_v61  ;;  %v3889_v33 = vadd.f32 %v3888_v31, %v3738_v18  ;;  %v4519_v1 = vpop.f32.mrb[49].mxu0 }
 0x7c5   :  { %5133 = vpow2.f32 %v3919_v0  ;;  %v3891_v2 = vpop.f32.mrb[50].mxu0 }
 0x7c6   :  { %5135 = vpow2.f32 %v3921_v3  ;;  %v3899_v4 = vsub.f32 0.0, %v3889_v33  ;;  %v3892_v5 = vadd.f32 %v3891_v2, %v3743_v22  ;;  %v4520_v6 = vpop.f32.mrb[51].mxu0 }
 0x7c8   :  { %v3913_v7 = vmul.f32 1.442695, %v3899_v4  ;;  %v3904_v8 = vsub.f32 0.0, %v3892_v5 }
 0x7c9   :  { %v5122_v39 = vpop.eup %5121 }
 0x7ca   :  { %v5124_v58 = vpop.eup %5123  ;;  %v3927_v9 = vadd.f32 1.0, %v5122_v39  ;;  %5137 = vpow2.f32 %v3913_v7  ;;  %v3923_v10 = vmul.f32 1.442695, %v3904_v8 }
 0x7cb   :  { %v5126_v34 = vpop.eup %5125  ;;  %v3945_v17 = vmul.f32 %v5153_v11, %v5124_v58 }
 0x7cc   :  { %v5128_v12 = vpop.eup %5127  ;;  %v3946_v13 = vmul.f32 %v5154_v38, %v5126_v34  ;;  %5139 = vrcp.f32 %v3927_v9 }
 0x7cd   :  { %v5130_v14 = vpop.eup %5129  ;;  %3955 = vst [vmem:[%s6677_s12] sm:$0xff] %v3945_v17  ;;  %v3950_v16 = vmul.f32 %v5155_v15, %v5128_v12  ;;  %5141 = vpow2.f32 %v3923_v10 }
 0x7ce   :  { %v5132_v18 = vpop.eup %5131  ;;  %3956 = vst [vmem:[%s6677_s12 + $0x8] sm:$0xff] %v3946_v13  ;;  %v3951_v20 = vmul.f32 %v5156_v19, %v5130_v14 }
 0x7cf   :  { %v5134_v21 = vpop.eup %5133  ;;  %3960 = vst [vmem:[%s6677_s12 + $0x28] sm:$0xff] %v3950_v16  ;;  %v3928_v22 = vadd.f32 1.0, %v5132_v18 }
 0x7d0   :  { %v5136_v23 = vpop.eup %5135  ;;  %3961 = vst [vmem:[%s6677_s12 + $0x30] sm:$0xff] %v3951_v20  ;;  %v3932_v25 = vadd.f32 1.0, %v5134_v21 }
 0x7d1   :  { %5143 = vrcp.f32 %v3928_v22  ;;  %v3933_v26 = vadd.f32 1.0, %v5136_v23 }
 0x7d2   :  { %5145 = vrcp.f32 %v3932_v25 }
 0x7d3   :  { %5147 = vrcp.f32 %v3933_v26 }
 0x7d4   :  { %v5138_v49 = vpop.eup %5137 }
 0x7d5   :  { %v3929_v28 = vadd.f32 1.0, %v5138_v49 }
 0x7d6   :  { %v5140_v29 = vpop.eup %5139 }
 0x7d7   :  { %v5142_v30 = vpop.eup %5141  ;;  %v3947_v43 = vmul.f32 %v5157_v24, %v5140_v29  ;;  %5149 = vrcp.f32 %v3929_v28 }
 0x7d8   :  { %v3934_v36 = vadd.f32 1.0, %v5142_v30 }
 0x7d9   :  { %3957 = vst [vmem:[%s6677_s12 + $0x10] sm:$0xff] %v3947_v43 }
 0x7da   :  { %5151 = vrcp.f32 %v3934_v36 }
 0x7db   :  { %v5144_v37 = vpop.eup %5143 }
 0x7dc   :  { %v5146_v40 = vpop.eup %5145  ;;  %v3948_v63 = vmul.f32 %v5158_v41, %v5144_v37 }
 0x7dd   :  { %v5148_v32 = vpop.eup %5147  ;;  %v3952_v45 = vmul.f32 %v5159_v44, %v5146_v40 }
 0x7de   :  { %3958 = vst [vmem:[%s6677_s12 + $0x18] sm:$0xff] %v3948_v63  ;;  %v3953_v47 = vmul.f32 %v5160_v46, %v5148_v32 }
 0x7df   :  { %3962 = vst [vmem:[%s6677_s12 + $0x38] sm:$0xff] %v3952_v45 }
 0x7e0   :  { %3963 = vst [vmem:[%s6677_s12 + $0x40] sm:$0xff] %v3953_v47 }
 0x7e1   :  { %v5150_v48 = vpop.eup %5149 }
 0x7e2   :  { %v3949_v50 = vmul.f32 %v5161_v35, %v5150_v48 }
 0x7e4   :  { %v5152_v42 = vpop.eup %5151  ;;  %3959 = vst [vmem:[%s6677_s12 + $0x20] sm:$0xff] %v3949_v50 }
 0x7e5   :  { %v3954_v52 = vmul.f32 %v5162_v51, %v5152_v42 }
 0x7e7   :  { %3964 = vst [vmem:[%s6677_s12 + $0x48] sm:$0xff] %v3954_v52 }

</bundles_post_ra>
